<compile_context>
chip_gen: v5e
topology: v5e:2x2
jax: 0.10.0
libtpu: 0.0.40
codegen_flags: <defaults>
</compile_context>

<pallas_src>
import math
import functools

import jax
import jax.numpy as jnp
from jax.experimental import pallas as pl
from jax.experimental.pallas import tpu as pltpu

# ---------------- model hyper-parameters (small, synthetic) ----------------
B = 2          # batch
L = 16         # max_len (sequence length)
D = 32         # d_model
F = 128        # d_inner (FFN hidden)
N_LAYER = 2    # number of encoder layers
VOCAB = 32     # word vocab size (synthetic)
TYPE_VOCAB = 8 # token-type vocab size (InputType writes token_type_id 4)
LN_EPS = 1e-12

BF16 = jnp.bfloat16


def _layernorm(x, gamma, beta):
    mu = jnp.mean(x, axis=-1, keepdims=True)
    var = jnp.mean((x - mu) * (x - mu), axis=-1, keepdims=True)
    inv = jax.lax.rsqrt(var + LN_EPS)
    return (x - mu) * inv * gamma + beta


def verifier_kernel(h_ref, mask_ref,
                    wqkv_ref, bqkv_ref, wo_ref, bo_ref, ln1g_ref, ln1b_ref,
                    w1_ref, b1_ref, w2_ref, b2_ref, ln2g_ref, ln2b_ref,
                    wcls_ref, bcls_ref,
                    out_ref):
    """Single invocation: whole batch resident in VMEM.

    h_ref   : (B*L, D)  flattened hidden states
    mask_ref: (B, L)    attention mask, 1 = attend, 0 = pad
    out_ref : (1, B)    logits (lane-contiguous single store)
    """
    h = h_ref[...].astype(jnp.float32)                    # (B*L, D)
    mask = mask_ref[...].astype(jnp.float32)              # (B, L)
    attn_bias = (1.0 - mask) * (-1e9)                     # additive key bias
    scale = 1.0 / math.sqrt(D)

    for l in range(N_LAYER):                              # static unroll (N_LAYER=2)
        # --- fused Q/K/V projection: one (B*L, D) @ (D, 3D) MXU push ---
        qkv = jnp.dot(h.astype(BF16), wqkv_ref[l].astype(BF16),
                      preferred_element_type=jnp.float32) + bqkv_ref[l]   # (B*L, 3D)
        q = qkv[:, 0:D]
        k = qkv[:, D:2 * D]
        v = qkv[:, 2 * D:3 * D]

        # --- per-batch single-head attention (static loop over B) ---
        ctx_parts = []
        for b in range(B):
            qb = q[b * L:(b + 1) * L, :]                  # (L, D)
            kb = k[b * L:(b + 1) * L, :]
            vb = v[b * L:(b + 1) * L, :]
            # contract last dims -> no explicit k transpose materialized
            scores = jax.lax.dot_general(
                qb.astype(BF16), kb.astype(BF16),
                (((1,), (1,)), ((), ())),
                preferred_element_type=jnp.float32) * scale               # (L, L)
            scores = scores + attn_bias[b:b + 1, :]
            m = jnp.max(scores, axis=-1, keepdims=True)
            e = jnp.exp(scores - m)
            denom = jnp.sum(e, axis=-1, keepdims=True)
            p = e * pl.reciprocal(denom, approx=True)                     # softmax
            ctx_parts.append(jnp.dot(p.astype(BF16), vb.astype(BF16),
                                     preferred_element_type=jnp.float32)) # (L, D)
        ctx = jnp.concatenate(ctx_parts, axis=0)                          # (B*L, D)

        attn_out = jnp.dot(ctx.astype(BF16), wo_ref[l].astype(BF16),
                           preferred_element_type=jnp.float32) + bo_ref[l]
        h = _layernorm(h + attn_out, ln1g_ref[l], ln1b_ref[l])            # post-LN

        # --- position-wise FFN ---
        ff = jnp.dot(h.astype(BF16), w1_ref[l].astype(BF16),
                     preferred_element_type=jnp.float32) + b1_ref[l]
        ff = jax.nn.gelu(ff, approximate=True)
        # TODO(synk): PyTorch nn.GELU default is exact erf; tanh approx used here.
        ff = jnp.dot(ff.astype(BF16), w2_ref[l].astype(BF16),
                     preferred_element_type=jnp.float32) + b2_ref[l]
        h = _layernorm(h + ff, ln2g_ref[l], ln2b_ref[l])

    # --- classify_layer on the LAST token (last_hidden_layer[:, -1, :]) ---
    # XLNet-style inputs are LEFT-padded, so position L-1 is always a real token.
    # Computed as a VPU dot (elementwise mul + lane reduce) — no degenerate MXU matmul.
    wcls = wcls_ref[...]                                                  # (1, D)
    logit_parts = []
    for b in range(B):
        row = h[b * L + L - 1:b * L + L, :]                               # (1, D)
        logit_parts.append(jnp.sum(row * wcls, axis=-1, keepdims=True))   # (1, 1)
    logits = jnp.concatenate(logit_parts, axis=1) + bcls_ref[...]         # (1, B)
    out_ref[...] = logits


def init_params(key):
    ks = jax.random.split(key, 16)
    std = 0.02
    p = {}
    p["word_emb"] = jax.random.normal(ks[0], (VOCAB, D), jnp.float32) * std
    p["type_emb"] = jax.random.normal(ks[1], (TYPE_VOCAB, D), jnp.float32) * std
    # stacked per-layer weights: leading axis = layer; Q/K/V fused along d_out
    p["wqkv"] = jax.random.normal(ks[2], (N_LAYER, D, 3 * D), jnp.float32) * std
    p["bqkv"] = jnp.zeros((N_LAYER, 1, 3 * D), jnp.float32)
    p["wo"] = jax.random.normal(ks[3], (N_LAYER, D, D), jnp.float32) * std
    p["bo"] = jnp.zeros((N_LAYER, 1, D), jnp.float32)
    p["ln1g"] = jnp.ones((N_LAYER, 1, D), jnp.float32)
    p["ln1b"] = jnp.zeros((N_LAYER, 1, D), jnp.float32)
    p["w1"] = jax.random.normal(ks[4], (N_LAYER, D, F), jnp.float32) * std
    p["b1"] = jnp.zeros((N_LAYER, 1, F), jnp.float32)
    p["w2"] = jax.random.normal(ks[5], (N_LAYER, F, D), jnp.float32) * std
    p["b2"] = jnp.zeros((N_LAYER, 1, D), jnp.float32)
    p["ln2g"] = jnp.ones((N_LAYER, 1, D), jnp.float32)
    p["ln2b"] = jnp.zeros((N_LAYER, 1, D), jnp.float32)
    # classify_layer = nn.Linear(d_model, 1); weight stored (1, D) (PyTorch layout)
    p["wcls"] = jax.random.normal(ks[6], (1, D), jnp.float32) * std
    p["bcls"] = jnp.zeros((1, 1), jnp.float32)
    return p


@jax.jit
def verifier_forward(inputs, params):
    """inputs: int32 [B, 3, L]  (input_ids, token_type_ids, attention_mask).
    Returns logits of shape [B]  (== Verifier.forward(...).reshape(-1))."""
    input_ids = inputs[:, 0, :]
    token_type_ids = inputs[:, 1, :]
    attention_mask = inputs[:, 2, :].astype(jnp.float32)                  # (B, L)

    # embedding lookup (glue, plain JAX gather)
    h = params["word_emb"][input_ids] + params["type_emb"][token_type_ids]  # (B, L, D)
    h_flat = h.reshape(B * L, D)                                            # (B*L, D)

    def full(arr):
        nd = arr.ndim
        return pl.BlockSpec(arr.shape, lambda i, _nd=nd: (0,) * _nd)

    stacked_names = ["wqkv", "bqkv", "wo", "bo", "ln1g", "ln1b",
                     "w1", "b1", "w2", "b2", "ln2g", "ln2b"]
    stacked = [params[n] for n in stacked_names]

    in_specs = (
        [full(h_flat), full(attention_mask)]
        + [full(params[n]) for n in stacked_names]
        + [full(params["wcls"]), full(params["bcls"])]
    )

    out = pl.pallas_call(
        verifier_kernel,
        out_shape=jax.ShapeDtypeStruct((1, B), jnp.float32),
        grid_spec=pltpu.PrefetchScalarGridSpec(
            num_scalar_prefetch=0,
            grid=(1,),                                   # single invocation: whole batch
            in_specs=in_specs,
            out_specs=pl.BlockSpec((1, B), lambda i: (0, 0)),
        ),
        compiler_params=pltpu.CompilerParams(
            dimension_semantics=("arbitrary",)),
    )(h_flat, attention_mask, *stacked, params["wcls"], params["bcls"])

    return out.reshape(-1)   # logits.reshape(-1)


if __name__ == "__main__":
    key = jax.random.PRNGKey(0)
    k_param, k_ids, k_types = jax.random.split(key, 3)

    params = init_params(k_param)

    # deterministic synthetic tokenized batch: [B, 3, L]
    input_ids = jax.random.randint(k_ids, (B, L), 0, VOCAB, dtype=jnp.int32)
    token_type_ids = jax.random.randint(k_types, (B, L), 0, TYPE_VOCAB,
                                        dtype=jnp.int32)
    # XLNet tokenizer pads on the LEFT, so the last position (read by the
    # classifier as last_hidden_layer[:, -1, :]) is always a real token.
    lengths = jnp.array([L, L - 5], dtype=jnp.int32)
    attention_mask = (jnp.arange(L)[None, :] >= (L - lengths)[:, None]).astype(jnp.int32)
    inputs = jnp.stack([input_ids, token_type_ids, attention_mask], axis=1)  # [B,3,L]

    logits = verifier_forward(inputs, params)
    logits = jax.block_until_ready(logits)

    assert logits.shape == (B,) and logits.dtype == jnp.float32
    assert bool(jnp.all(jnp.isfinite(logits)))
    print("KERNEL_OK")
</pallas_src>

<mosaic_0001>
module attributes {stable_mosaic.version = 11 : i64} {
  func.func @verifier_kernel(%arg0: i32, %arg1: memref<32x32xf32, #tpu.memory_space<vmem>>, %arg2: memref<2x16xf32, #tpu.memory_space<vmem>>, %arg3: memref<2x32x96xf32, #tpu.memory_space<vmem>>, %arg4: memref<2x1x96xf32, #tpu.memory_space<vmem>>, %arg5: memref<2x32x32xf32, #tpu.memory_space<vmem>>, %arg6: memref<2x1x32xf32, #tpu.memory_space<vmem>>, %arg7: memref<2x1x32xf32, #tpu.memory_space<vmem>>, %arg8: memref<2x1x32xf32, #tpu.memory_space<vmem>>, %arg9: memref<2x32x128xf32, #tpu.memory_space<vmem>>, %arg10: memref<2x1x128xf32, #tpu.memory_space<vmem>>, %arg11: memref<2x128x32xf32, #tpu.memory_space<vmem>>, %arg12: memref<2x1x32xf32, #tpu.memory_space<vmem>>, %arg13: memref<2x1x32xf32, #tpu.memory_space<vmem>>, %arg14: memref<2x1x32xf32, #tpu.memory_space<vmem>>, %arg15: memref<1x32xf32, #tpu.memory_space<vmem>>, %arg16: memref<1x1xf32, #tpu.memory_space<vmem>>, %arg17: memref<1x2xf32, #tpu.memory_space<vmem>>) attributes {dimension_semantics = [#tpu.dimension_semantics<arbitrary>], iteration_bounds = array<i64: 1>, scalar_prefetch = 0 : i64, scratch_operands = 0 : i64, tpu.core_type = #tpu.core_type<tc>, window_params = [{pipeline_mode = #tpu.pipeline_mode<synchronous>, transform_indices = @transform_0, window_bounds = array<i64: 32, 32>}, {pipeline_mode = #tpu.pipeline_mode<synchronous>, transform_indices = @transform_1, window_bounds = array<i64: 2, 16>}, {pipeline_mode = #tpu.pipeline_mode<synchronous>, transform_indices = @transform_2, window_bounds = array<i64: 2, 32, 96>}, {pipeline_mode = #tpu.pipeline_mode<synchronous>, transform_indices = @transform_3, window_bounds = array<i64: 2, 1, 96>}, {pipeline_mode = #tpu.pipeline_mode<synchronous>, transform_indices = @transform_4, window_bounds = array<i64: 2, 32, 32>}, {pipeline_mode = #tpu.pipeline_mode<synchronous>, transform_indices = @transform_5, window_bounds = array<i64: 2, 1, 32>}, {pipeline_mode = #tpu.pipeline_mode<synchronous>, transform_indices = @transform_6, window_bounds = array<i64: 2, 1, 32>}, {pipeline_mode = #tpu.pipeline_mode<synchronous>, transform_indices = @transform_7, window_bounds = array<i64: 2, 1, 32>}, {pipeline_mode = #tpu.pipeline_mode<synchronous>, transform_indices = @transform_8, window_bounds = array<i64: 2, 32, 128>}, {pipeline_mode = #tpu.pipeline_mode<synchronous>, transform_indices = @transform_9, window_bounds = array<i64: 2, 1, 128>}, {pipeline_mode = #tpu.pipeline_mode<synchronous>, transform_indices = @transform_10, window_bounds = array<i64: 2, 128, 32>}, {pipeline_mode = #tpu.pipeline_mode<synchronous>, transform_indices = @transform_11, window_bounds = array<i64: 2, 1, 32>}, {pipeline_mode = #tpu.pipeline_mode<synchronous>, transform_indices = @transform_12, window_bounds = array<i64: 2, 1, 32>}, {pipeline_mode = #tpu.pipeline_mode<synchronous>, transform_indices = @transform_13, window_bounds = array<i64: 2, 1, 32>}, {pipeline_mode = #tpu.pipeline_mode<synchronous>, transform_indices = @transform_14, window_bounds = array<i64: 1, 32>}, {pipeline_mode = #tpu.pipeline_mode<synchronous>, transform_indices = @transform_15, window_bounds = array<i64: 1, 1>}, {pipeline_mode = #tpu.pipeline_mode<synchronous>, transform_indices = @transform_16, window_bounds = array<i64: 1, 2>}]} {
    %c0 = arith.constant 0 : index
    %c0_0 = arith.constant 0 : index
    %0 = vector.load %arg1[%c0, %c0_0] : memref<32x32xf32, #tpu.memory_space<vmem>>, vector<32x32xf32>
    %c0_1 = arith.constant 0 : index
    %c0_2 = arith.constant 0 : index
    %1 = vector.load %arg2[%c0_1, %c0_2] : memref<2x16xf32, #tpu.memory_space<vmem>>, vector<2x16xf32>
    %cst = arith.constant 1.000000e+00 : f32
    %2 = vector.broadcast %cst : f32 to vector<2x16xf32>
    %3 = arith.subf %2, %1 : vector<2x16xf32>
    %cst_3 = arith.constant -1.000000e+09 : f32
    %4 = vector.broadcast %cst_3 : f32 to vector<2x16xf32>
    %5 = arith.mulf %3, %4 : vector<2x16xf32>
    %6 = arith.truncf %0 : vector<32x32xf32> to vector<32x32xbf16>
    %c0_4 = arith.constant 0 : index
    %c0_5 = arith.constant 0 : index
    %c0_6 = arith.constant 0 : index
    %7 = vector.load %arg3[%c0_4, %c0_5, %c0_6] : memref<2x32x96xf32, #tpu.memory_space<vmem>>, vector<1x32x96xf32>
    %8 = vector.shape_cast %7 : vector<1x32x96xf32> to vector<32x96xf32>
    %9 = arith.truncf %8 : vector<32x96xf32> to vector<32x96xbf16>
    %cst_7 = arith.constant dense<0.000000e+00> : vector<32x96xf32>
    %10 = tpu.matmul %6, %9, %cst_7 {dimension_numbers = #tpu.dot_dimension_numbers<[1], [0], [0], [1], [0, 0, 1, 1], [], []>} : vector<32x32xbf16>, vector<32x96xbf16>, vector<32x96xf32> -> vector<32x96xf32>
    %c0_8 = arith.constant 0 : index
    %c0_9 = arith.constant 0 : index
    %c0_10 = arith.constant 0 : index
    %11 = vector.load %arg4[%c0_8, %c0_9, %c0_10] : memref<2x1x96xf32, #tpu.memory_space<vmem>>, vector<1x1x96xf32>
    %12 = vector.shape_cast %11 : vector<1x1x96xf32> to vector<1x96xf32>
    %13 = vector.broadcast %12 : vector<1x96xf32> to vector<32x96xf32>
    %14 = arith.addf %10, %13 : vector<32x96xf32>
    %15 = vector.extract_strided_slice %14 {offsets = [0, 0], sizes = [32, 32], strides = [1, 1]} : vector<32x96xf32> to vector<32x32xf32>
    %16 = vector.extract_strided_slice %14 {offsets = [0, 32], sizes = [32, 32], strides = [1, 1]} : vector<32x96xf32> to vector<32x32xf32>
    %17 = vector.extract_strided_slice %14 {offsets = [0, 64], sizes = [32, 32], strides = [1, 1]} : vector<32x96xf32> to vector<32x32xf32>
    %18 = vector.extract_strided_slice %15 {offsets = [0, 0], sizes = [16, 32], strides = [1, 1]} : vector<32x32xf32> to vector<16x32xf32>
    %19 = vector.extract_strided_slice %16 {offsets = [0, 0], sizes = [16, 32], strides = [1, 1]} : vector<32x32xf32> to vector<16x32xf32>
    %20 = vector.extract_strided_slice %17 {offsets = [0, 0], sizes = [16, 32], strides = [1, 1]} : vector<32x32xf32> to vector<16x32xf32>
    %21 = arith.truncf %18 : vector<16x32xf32> to vector<16x32xbf16>
    %22 = arith.truncf %19 : vector<16x32xf32> to vector<16x32xbf16>
    %cst_11 = arith.constant dense<0.000000e+00> : vector<16x16xf32>
    %23 = tpu.matmul %21, %22, %cst_11 {dimension_numbers = #tpu.dot_dimension_numbers<[1], [1], [0], [0], [0, 0, 1, 0], [], []>} : vector<16x32xbf16>, vector<16x32xbf16>, vector<16x16xf32> -> vector<16x16xf32>
    %cst_12 = arith.constant 0.176776692 : f32
    %24 = vector.broadcast %cst_12 : f32 to vector<16x16xf32>
    %25 = arith.mulf %23, %24 : vector<16x16xf32>
    %26 = vector.extract_strided_slice %5 {offsets = [0, 0], sizes = [1, 16], strides = [1, 1]} : vector<2x16xf32> to vector<1x16xf32>
    %27 = vector.broadcast %26 : vector<1x16xf32> to vector<16x16xf32>
    %28 = arith.addf %25, %27 : vector<16x16xf32>
    %cst_13 = arith.constant dense<0xFF800000> : vector<16xf32>
    %29 = vector.multi_reduction <maximumf>, %28, %cst_13 [1] : vector<16x16xf32> to vector<16xf32>
    %30 = vector.shape_cast %29 : vector<16xf32> to vector<16x1xf32>
    %31 = vector.broadcast %30 : vector<16x1xf32> to vector<16x16xf32>
    %32 = arith.subf %28, %31 : vector<16x16xf32>
    %33 = math.exp %32 : vector<16x16xf32>
    %cst_14 = arith.constant dense<0.000000e+00> : vector<16xf32>
    %34 = vector.multi_reduction <add>, %33, %cst_14 [1] : vector<16x16xf32> to vector<16xf32>
    %35 = vector.shape_cast %34 : vector<16xf32> to vector<16x1xf32>
    %36 = tpu.reciprocal %35 {approx = true} : vector<16x1xf32> -> vector<16x1xf32>
    %37 = vector.broadcast %36 : vector<16x1xf32> to vector<16x16xf32>
    %38 = arith.mulf %33, %37 : vector<16x16xf32>
    %39 = arith.truncf %38 : vector<16x16xf32> to vector<16x16xbf16>
    %40 = arith.truncf %20 : vector<16x32xf32> to vector<16x32xbf16>
    %cst_15 = arith.constant dense<0.000000e+00> : vector<16x32xf32>
    %41 = tpu.matmul %39, %40, %cst_15 {dimension_numbers = #tpu.dot_dimension_numbers<[1], [0], [0], [1], [0, 0, 1, 1], [], []>} : vector<16x16xbf16>, vector<16x32xbf16>, vector<16x32xf32> -> vector<16x32xf32>
    %42 = vector.extract_strided_slice %15 {offsets = [16, 0], sizes = [16, 32], strides = [1, 1]} : vector<32x32xf32> to vector<16x32xf32>
    %43 = vector.extract_strided_slice %16 {offsets = [16, 0], sizes = [16, 32], strides = [1, 1]} : vector<32x32xf32> to vector<16x32xf32>
    %44 = vector.extract_strided_slice %17 {offsets = [16, 0], sizes = [16, 32], strides = [1, 1]} : vector<32x32xf32> to vector<16x32xf32>
    %45 = arith.truncf %42 : vector<16x32xf32> to vector<16x32xbf16>
    %46 = arith.truncf %43 : vector<16x32xf32> to vector<16x32xbf16>
    %cst_16 = arith.constant dense<0.000000e+00> : vector<16x16xf32>
    %47 = tpu.matmul %45, %46, %cst_16 {dimension_numbers = #tpu.dot_dimension_numbers<[1], [1], [0], [0], [0, 0, 1, 0], [], []>} : vector<16x32xbf16>, vector<16x32xbf16>, vector<16x16xf32> -> vector<16x16xf32>
    %cst_17 = arith.constant 0.176776692 : f32
    %48 = vector.broadcast %cst_17 : f32 to vector<16x16xf32>
    %49 = arith.mulf %47, %48 : vector<16x16xf32>
    %50 = vector.extract_strided_slice %5 {offsets = [1, 0], sizes = [1, 16], strides = [1, 1]} : vector<2x16xf32> to vector<1x16xf32>
    %51 = vector.broadcast %50 : vector<1x16xf32> to vector<16x16xf32>
    %52 = arith.addf %49, %51 : vector<16x16xf32>
    %cst_18 = arith.constant dense<0xFF800000> : vector<16xf32>
    %53 = vector.multi_reduction <maximumf>, %52, %cst_18 [1] : vector<16x16xf32> to vector<16xf32>
    %54 = vector.shape_cast %53 : vector<16xf32> to vector<16x1xf32>
    %55 = vector.broadcast %54 : vector<16x1xf32> to vector<16x16xf32>
    %56 = arith.subf %52, %55 : vector<16x16xf32>
    %57 = math.exp %56 : vector<16x16xf32>
    %cst_19 = arith.constant dense<0.000000e+00> : vector<16xf32>
    %58 = vector.multi_reduction <add>, %57, %cst_19 [1] : vector<16x16xf32> to vector<16xf32>
    %59 = vector.shape_cast %58 : vector<16xf32> to vector<16x1xf32>
    %60 = tpu.reciprocal %59 {approx = true} : vector<16x1xf32> -> vector<16x1xf32>
    %61 = vector.broadcast %60 : vector<16x1xf32> to vector<16x16xf32>
    %62 = arith.mulf %57, %61 : vector<16x16xf32>
    %63 = arith.truncf %62 : vector<16x16xf32> to vector<16x16xbf16>
    %64 = arith.truncf %44 : vector<16x32xf32> to vector<16x32xbf16>
    %cst_20 = arith.constant dense<0.000000e+00> : vector<16x32xf32>
    %65 = tpu.matmul %63, %64, %cst_20 {dimension_numbers = #tpu.dot_dimension_numbers<[1], [0], [0], [1], [0, 0, 1, 1], [], []>} : vector<16x16xbf16>, vector<16x32xbf16>, vector<16x32xf32> -> vector<16x32xf32>
    %66 = tpu.concatenate %41, %65 in 0 : vector<16x32xf32>, vector<16x32xf32> -> vector<32x32xf32>
    %67 = arith.truncf %66 : vector<32x32xf32> to vector<32x32xbf16>
    %c0_21 = arith.constant 0 : index
    %c0_22 = arith.constant 0 : index
    %c0_23 = arith.constant 0 : index
    %68 = vector.load %arg5[%c0_21, %c0_22, %c0_23] : memref<2x32x32xf32, #tpu.memory_space<vmem>>, vector<1x32x32xf32>
    %69 = vector.shape_cast %68 : vector<1x32x32xf32> to vector<32x32xf32>
    %70 = arith.truncf %69 : vector<32x32xf32> to vector<32x32xbf16>
    %cst_24 = arith.constant dense<0.000000e+00> : vector<32x32xf32>
    %71 = tpu.matmul %67, %70, %cst_24 {dimension_numbers = #tpu.dot_dimension_numbers<[1], [0], [0], [1], [0, 0, 1, 1], [], []>} : vector<32x32xbf16>, vector<32x32xbf16>, vector<32x32xf32> -> vector<32x32xf32>
    %c0_25 = arith.constant 0 : index
    %c0_26 = arith.constant 0 : index
    %c0_27 = arith.constant 0 : index
    %72 = vector.load %arg6[%c0_25, %c0_26, %c0_27] : memref<2x1x32xf32, #tpu.memory_space<vmem>>, vector<1x1x32xf32>
    %73 = vector.shape_cast %72 : vector<1x1x32xf32> to vector<1x32xf32>
    %74 = vector.broadcast %73 : vector<1x32xf32> to vector<32x32xf32>
    %75 = arith.addf %71, %74 : vector<32x32xf32>
    %76 = arith.addf %0, %75 : vector<32x32xf32>
    %c0_28 = arith.constant 0 : index
    %c0_29 = arith.constant 0 : index
    %c0_30 = arith.constant 0 : index
    %77 = vector.load %arg7[%c0_28, %c0_29, %c0_30] : memref<2x1x32xf32, #tpu.memory_space<vmem>>, vector<1x1x32xf32>
    %78 = vector.shape_cast %77 : vector<1x1x32xf32> to vector<1x32xf32>
    %c0_31 = arith.constant 0 : index
    %c0_32 = arith.constant 0 : index
    %c0_33 = arith.constant 0 : index
    %79 = vector.load %arg8[%c0_31, %c0_32, %c0_33] : memref<2x1x32xf32, #tpu.memory_space<vmem>>, vector<1x1x32xf32>
    %80 = vector.shape_cast %79 : vector<1x1x32xf32> to vector<1x32xf32>
    %cst_34 = arith.constant dense<0.000000e+00> : vector<32xf32>
    %81 = vector.multi_reduction <add>, %76, %cst_34 [1] : vector<32x32xf32> to vector<32xf32>
    %82 = vector.shape_cast %81 : vector<32xf32> to vector<32x1xf32>
    %cst_35 = arith.constant 3.200000e+01 : f32
    %83 = vector.broadcast %cst_35 : f32 to vector<32x1xf32>
    %84 = arith.divf %82, %83 : vector<32x1xf32>
    %85 = vector.broadcast %84 : vector<32x1xf32> to vector<32x32xf32>
    %86 = arith.subf %76, %85 : vector<32x32xf32>
    %87 = vector.broadcast %84 : vector<32x1xf32> to vector<32x32xf32>
    %88 = arith.subf %76, %87 : vector<32x32xf32>
    %89 = arith.mulf %86, %88 : vector<32x32xf32>
    %cst_36 = arith.constant dense<0.000000e+00> : vector<32xf32>
    %90 = vector.multi_reduction <add>, %89, %cst_36 [1] : vector<32x32xf32> to vector<32xf32>
    %91 = vector.shape_cast %90 : vector<32xf32> to vector<32x1xf32>
    %cst_37 = arith.constant 3.200000e+01 : f32
    %92 = vector.broadcast %cst_37 : f32 to vector<32x1xf32>
    %93 = arith.divf %91, %92 : vector<32x1xf32>
    %cst_38 = arith.constant 9.99999996E-13 : f32
    %94 = vector.broadcast %cst_38 : f32 to vector<32x1xf32>
    %95 = arith.addf %93, %94 : vector<32x1xf32>
    %96 = math.rsqrt %95 : vector<32x1xf32>
    %97 = vector.broadcast %84 : vector<32x1xf32> to vector<32x32xf32>
    %98 = arith.subf %76, %97 : vector<32x32xf32>
    %99 = vector.broadcast %96 : vector<32x1xf32> to vector<32x32xf32>
    %100 = arith.mulf %98, %99 : vector<32x32xf32>
    %101 = vector.broadcast %78 : vector<1x32xf32> to vector<32x32xf32>
    %102 = arith.mulf %100, %101 : vector<32x32xf32>
    %103 = vector.broadcast %80 : vector<1x32xf32> to vector<32x32xf32>
    %104 = arith.addf %102, %103 : vector<32x32xf32>
    %105 = arith.truncf %104 : vector<32x32xf32> to vector<32x32xbf16>
    %c0_39 = arith.constant 0 : index
    %c0_40 = arith.constant 0 : index
    %c0_41 = arith.constant 0 : index
    %106 = vector.load %arg9[%c0_39, %c0_40, %c0_41] : memref<2x32x128xf32, #tpu.memory_space<vmem>>, vector<1x32x128xf32>
    %107 = vector.shape_cast %106 : vector<1x32x128xf32> to vector<32x128xf32>
    %108 = arith.truncf %107 : vector<32x128xf32> to vector<32x128xbf16>
    %cst_42 = arith.constant dense<0.000000e+00> : vector<32x128xf32>
    %109 = tpu.matmul %105, %108, %cst_42 {dimension_numbers = #tpu.dot_dimension_numbers<[1], [0], [0], [1], [0, 0, 1, 1], [], []>} : vector<32x32xbf16>, vector<32x128xbf16>, vector<32x128xf32> -> vector<32x128xf32>
    %c0_43 = arith.constant 0 : index
    %c0_44 = arith.constant 0 : index
    %c0_45 = arith.constant 0 : index
    %110 = vector.load %arg10[%c0_43, %c0_44, %c0_45] : memref<2x1x128xf32, #tpu.memory_space<vmem>>, vector<1x1x128xf32>
    %111 = vector.shape_cast %110 : vector<1x1x128xf32> to vector<1x128xf32>
    %112 = vector.broadcast %111 : vector<1x128xf32> to vector<32x128xf32>
    %113 = arith.addf %109, %112 : vector<32x128xf32>
    %114 = arith.mulf %113, %113 : vector<32x128xf32>
    %115 = arith.mulf %113, %114 : vector<32x128xf32>
    %cst_46 = arith.constant 4.471500e-02 : f32
    %116 = vector.broadcast %cst_46 : f32 to vector<32x128xf32>
    %117 = arith.mulf %116, %115 : vector<32x128xf32>
    %118 = arith.addf %113, %117 : vector<32x128xf32>
    %cst_47 = arith.constant 0.797884583 : f32
    %119 = vector.broadcast %cst_47 : f32 to vector<32x128xf32>
    %120 = arith.mulf %119, %118 : vector<32x128xf32>
    %121 = math.tanh %120 : vector<32x128xf32>
    %cst_48 = arith.constant 1.000000e+00 : f32
    %122 = vector.broadcast %cst_48 : f32 to vector<32x128xf32>
    %123 = arith.addf %122, %121 : vector<32x128xf32>
    %cst_49 = arith.constant 5.000000e-01 : f32
    %124 = vector.broadcast %cst_49 : f32 to vector<32x128xf32>
    %125 = arith.mulf %124, %123 : vector<32x128xf32>
    %126 = arith.mulf %113, %125 : vector<32x128xf32>
    %127 = arith.truncf %126 : vector<32x128xf32> to vector<32x128xbf16>
    %c0_50 = arith.constant 0 : index
    %c0_51 = arith.constant 0 : index
    %c0_52 = arith.constant 0 : index
    %128 = vector.load %arg11[%c0_50, %c0_51, %c0_52] : memref<2x128x32xf32, #tpu.memory_space<vmem>>, vector<1x128x32xf32>
    %129 = vector.shape_cast %128 : vector<1x128x32xf32> to vector<128x32xf32>
    %130 = arith.truncf %129 : vector<128x32xf32> to vector<128x32xbf16>
    %cst_53 = arith.constant dense<0.000000e+00> : vector<32x32xf32>
    %131 = tpu.matmul %127, %130, %cst_53 {dimension_numbers = #tpu.dot_dimension_numbers<[1], [0], [0], [1], [0, 0, 1, 1], [], []>} : vector<32x128xbf16>, vector<128x32xbf16>, vector<32x32xf32> -> vector<32x32xf32>
    %c0_54 = arith.constant 0 : index
    %c0_55 = arith.constant 0 : index
    %c0_56 = arith.constant 0 : index
    %132 = vector.load %arg12[%c0_54, %c0_55, %c0_56] : memref<2x1x32xf32, #tpu.memory_space<vmem>>, vector<1x1x32xf32>
    %133 = vector.shape_cast %132 : vector<1x1x32xf32> to vector<1x32xf32>
    %134 = vector.broadcast %133 : vector<1x32xf32> to vector<32x32xf32>
    %135 = arith.addf %131, %134 : vector<32x32xf32>
    %136 = arith.addf %104, %135 : vector<32x32xf32>
    %c0_57 = arith.constant 0 : index
    %c0_58 = arith.constant 0 : index
    %c0_59 = arith.constant 0 : index
    %137 = vector.load %arg13[%c0_57, %c0_58, %c0_59] : memref<2x1x32xf32, #tpu.memory_space<vmem>>, vector<1x1x32xf32>
    %138 = vector.shape_cast %137 : vector<1x1x32xf32> to vector<1x32xf32>
    %c0_60 = arith.constant 0 : index
    %c0_61 = arith.constant 0 : index
    %c0_62 = arith.constant 0 : index
    %139 = vector.load %arg14[%c0_60, %c0_61, %c0_62] : memref<2x1x32xf32, #tpu.memory_space<vmem>>, vector<1x1x32xf32>
    %140 = vector.shape_cast %139 : vector<1x1x32xf32> to vector<1x32xf32>
    %cst_63 = arith.constant dense<0.000000e+00> : vector<32xf32>
    %141 = vector.multi_reduction <add>, %136, %cst_63 [1] : vector<32x32xf32> to vector<32xf32>
    %142 = vector.shape_cast %141 : vector<32xf32> to vector<32x1xf32>
    %cst_64 = arith.constant 3.200000e+01 : f32
    %143 = vector.broadcast %cst_64 : f32 to vector<32x1xf32>
    %144 = arith.divf %142, %143 : vector<32x1xf32>
    %145 = vector.broadcast %144 : vector<32x1xf32> to vector<32x32xf32>
    %146 = arith.subf %136, %145 : vector<32x32xf32>
    %147 = vector.broadcast %144 : vector<32x1xf32> to vector<32x32xf32>
    %148 = arith.subf %136, %147 : vector<32x32xf32>
    %149 = arith.mulf %146, %148 : vector<32x32xf32>
    %cst_65 = arith.constant dense<0.000000e+00> : vector<32xf32>
    %150 = vector.multi_reduction <add>, %149, %cst_65 [1] : vector<32x32xf32> to vector<32xf32>
    %151 = vector.shape_cast %150 : vector<32xf32> to vector<32x1xf32>
    %cst_66 = arith.constant 3.200000e+01 : f32
    %152 = vector.broadcast %cst_66 : f32 to vector<32x1xf32>
    %153 = arith.divf %151, %152 : vector<32x1xf32>
    %cst_67 = arith.constant 9.99999996E-13 : f32
    %154 = vector.broadcast %cst_67 : f32 to vector<32x1xf32>
    %155 = arith.addf %153, %154 : vector<32x1xf32>
    %156 = math.rsqrt %155 : vector<32x1xf32>
    %157 = vector.broadcast %144 : vector<32x1xf32> to vector<32x32xf32>
    %158 = arith.subf %136, %157 : vector<32x32xf32>
    %159 = vector.broadcast %156 : vector<32x1xf32> to vector<32x32xf32>
    %160 = arith.mulf %158, %159 : vector<32x32xf32>
    %161 = vector.broadcast %138 : vector<1x32xf32> to vector<32x32xf32>
    %162 = arith.mulf %160, %161 : vector<32x32xf32>
    %163 = vector.broadcast %140 : vector<1x32xf32> to vector<32x32xf32>
    %164 = arith.addf %162, %163 : vector<32x32xf32>
    %165 = arith.truncf %164 : vector<32x32xf32> to vector<32x32xbf16>
    %c1 = arith.constant 1 : index
    %c0_68 = arith.constant 0 : index
    %c0_69 = arith.constant 0 : index
    %166 = vector.load %arg3[%c1, %c0_68, %c0_69] : memref<2x32x96xf32, #tpu.memory_space<vmem>>, vector<1x32x96xf32>
    %167 = vector.shape_cast %166 : vector<1x32x96xf32> to vector<32x96xf32>
    %168 = arith.truncf %167 : vector<32x96xf32> to vector<32x96xbf16>
    %cst_70 = arith.constant dense<0.000000e+00> : vector<32x96xf32>
    %169 = tpu.matmul %165, %168, %cst_70 {dimension_numbers = #tpu.dot_dimension_numbers<[1], [0], [0], [1], [0, 0, 1, 1], [], []>} : vector<32x32xbf16>, vector<32x96xbf16>, vector<32x96xf32> -> vector<32x96xf32>
    %c1_71 = arith.constant 1 : index
    %c0_72 = arith.constant 0 : index
    %c0_73 = arith.constant 0 : index
    %170 = vector.load %arg4[%c1_71, %c0_72, %c0_73] : memref<2x1x96xf32, #tpu.memory_space<vmem>>, vector<1x1x96xf32>
    %171 = vector.shape_cast %170 : vector<1x1x96xf32> to vector<1x96xf32>
    %172 = vector.broadcast %171 : vector<1x96xf32> to vector<32x96xf32>
    %173 = arith.addf %169, %172 : vector<32x96xf32>
    %174 = vector.extract_strided_slice %173 {offsets = [0, 0], sizes = [32, 32], strides = [1, 1]} : vector<32x96xf32> to vector<32x32xf32>
    %175 = vector.extract_strided_slice %173 {offsets = [0, 32], sizes = [32, 32], strides = [1, 1]} : vector<32x96xf32> to vector<32x32xf32>
    %176 = vector.extract_strided_slice %173 {offsets = [0, 64], sizes = [32, 32], strides = [1, 1]} : vector<32x96xf32> to vector<32x32xf32>
    %177 = vector.extract_strided_slice %174 {offsets = [0, 0], sizes = [16, 32], strides = [1, 1]} : vector<32x32xf32> to vector<16x32xf32>
    %178 = vector.extract_strided_slice %175 {offsets = [0, 0], sizes = [16, 32], strides = [1, 1]} : vector<32x32xf32> to vector<16x32xf32>
    %179 = vector.extract_strided_slice %176 {offsets = [0, 0], sizes = [16, 32], strides = [1, 1]} : vector<32x32xf32> to vector<16x32xf32>
    %180 = arith.truncf %177 : vector<16x32xf32> to vector<16x32xbf16>
    %181 = arith.truncf %178 : vector<16x32xf32> to vector<16x32xbf16>
    %cst_74 = arith.constant dense<0.000000e+00> : vector<16x16xf32>
    %182 = tpu.matmul %180, %181, %cst_74 {dimension_numbers = #tpu.dot_dimension_numbers<[1], [1], [0], [0], [0, 0, 1, 0], [], []>} : vector<16x32xbf16>, vector<16x32xbf16>, vector<16x16xf32> -> vector<16x16xf32>
    %cst_75 = arith.constant 0.176776692 : f32
    %183 = vector.broadcast %cst_75 : f32 to vector<16x16xf32>
    %184 = arith.mulf %182, %183 : vector<16x16xf32>
    %185 = vector.extract_strided_slice %5 {offsets = [0, 0], sizes = [1, 16], strides = [1, 1]} : vector<2x16xf32> to vector<1x16xf32>
    %186 = vector.broadcast %185 : vector<1x16xf32> to vector<16x16xf32>
    %187 = arith.addf %184, %186 : vector<16x16xf32>
    %cst_76 = arith.constant dense<0xFF800000> : vector<16xf32>
    %188 = vector.multi_reduction <maximumf>, %187, %cst_76 [1] : vector<16x16xf32> to vector<16xf32>
    %189 = vector.shape_cast %188 : vector<16xf32> to vector<16x1xf32>
    %190 = vector.broadcast %189 : vector<16x1xf32> to vector<16x16xf32>
    %191 = arith.subf %187, %190 : vector<16x16xf32>
    %192 = math.exp %191 : vector<16x16xf32>
    %cst_77 = arith.constant dense<0.000000e+00> : vector<16xf32>
    %193 = vector.multi_reduction <add>, %192, %cst_77 [1] : vector<16x16xf32> to vector<16xf32>
    %194 = vector.shape_cast %193 : vector<16xf32> to vector<16x1xf32>
    %195 = tpu.reciprocal %194 {approx = true} : vector<16x1xf32> -> vector<16x1xf32>
    %196 = vector.broadcast %195 : vector<16x1xf32> to vector<16x16xf32>
    %197 = arith.mulf %192, %196 : vector<16x16xf32>
    %198 = arith.truncf %197 : vector<16x16xf32> to vector<16x16xbf16>
    %199 = arith.truncf %179 : vector<16x32xf32> to vector<16x32xbf16>
    %cst_78 = arith.constant dense<0.000000e+00> : vector<16x32xf32>
    %200 = tpu.matmul %198, %199, %cst_78 {dimension_numbers = #tpu.dot_dimension_numbers<[1], [0], [0], [1], [0, 0, 1, 1], [], []>} : vector<16x16xbf16>, vector<16x32xbf16>, vector<16x32xf32> -> vector<16x32xf32>
    %201 = vector.extract_strided_slice %174 {offsets = [16, 0], sizes = [16, 32], strides = [1, 1]} : vector<32x32xf32> to vector<16x32xf32>
    %202 = vector.extract_strided_slice %175 {offsets = [16, 0], sizes = [16, 32], strides = [1, 1]} : vector<32x32xf32> to vector<16x32xf32>
    %203 = vector.extract_strided_slice %176 {offsets = [16, 0], sizes = [16, 32], strides = [1, 1]} : vector<32x32xf32> to vector<16x32xf32>
    %204 = arith.truncf %201 : vector<16x32xf32> to vector<16x32xbf16>
    %205 = arith.truncf %202 : vector<16x32xf32> to vector<16x32xbf16>
    %cst_79 = arith.constant dense<0.000000e+00> : vector<16x16xf32>
    %206 = tpu.matmul %204, %205, %cst_79 {dimension_numbers = #tpu.dot_dimension_numbers<[1], [1], [0], [0], [0, 0, 1, 0], [], []>} : vector<16x32xbf16>, vector<16x32xbf16>, vector<16x16xf32> -> vector<16x16xf32>
    %cst_80 = arith.constant 0.176776692 : f32
    %207 = vector.broadcast %cst_80 : f32 to vector<16x16xf32>
    %208 = arith.mulf %206, %207 : vector<16x16xf32>
    %209 = vector.extract_strided_slice %5 {offsets = [1, 0], sizes = [1, 16], strides = [1, 1]} : vector<2x16xf32> to vector<1x16xf32>
    %210 = vector.broadcast %209 : vector<1x16xf32> to vector<16x16xf32>
    %211 = arith.addf %208, %210 : vector<16x16xf32>
    %cst_81 = arith.constant dense<0xFF800000> : vector<16xf32>
    %212 = vector.multi_reduction <maximumf>, %211, %cst_81 [1] : vector<16x16xf32> to vector<16xf32>
    %213 = vector.shape_cast %212 : vector<16xf32> to vector<16x1xf32>
    %214 = vector.broadcast %213 : vector<16x1xf32> to vector<16x16xf32>
    %215 = arith.subf %211, %214 : vector<16x16xf32>
    %216 = math.exp %215 : vector<16x16xf32>
    %cst_82 = arith.constant dense<0.000000e+00> : vector<16xf32>
    %217 = vector.multi_reduction <add>, %216, %cst_82 [1] : vector<16x16xf32> to vector<16xf32>
    %218 = vector.shape_cast %217 : vector<16xf32> to vector<16x1xf32>
    %219 = tpu.reciprocal %218 {approx = true} : vector<16x1xf32> -> vector<16x1xf32>
    %220 = vector.broadcast %219 : vector<16x1xf32> to vector<16x16xf32>
    %221 = arith.mulf %216, %220 : vector<16x16xf32>
    %222 = arith.truncf %221 : vector<16x16xf32> to vector<16x16xbf16>
    %223 = arith.truncf %203 : vector<16x32xf32> to vector<16x32xbf16>
    %cst_83 = arith.constant dense<0.000000e+00> : vector<16x32xf32>
    %224 = tpu.matmul %222, %223, %cst_83 {dimension_numbers = #tpu.dot_dimension_numbers<[1], [0], [0], [1], [0, 0, 1, 1], [], []>} : vector<16x16xbf16>, vector<16x32xbf16>, vector<16x32xf32> -> vector<16x32xf32>
    %225 = tpu.concatenate %200, %224 in 0 : vector<16x32xf32>, vector<16x32xf32> -> vector<32x32xf32>
    %226 = arith.truncf %225 : vector<32x32xf32> to vector<32x32xbf16>
    %c1_84 = arith.constant 1 : index
    %c0_85 = arith.constant 0 : index
    %c0_86 = arith.constant 0 : index
    %227 = vector.load %arg5[%c1_84, %c0_85, %c0_86] : memref<2x32x32xf32, #tpu.memory_space<vmem>>, vector<1x32x32xf32>
    %228 = vector.shape_cast %227 : vector<1x32x32xf32> to vector<32x32xf32>
    %229 = arith.truncf %228 : vector<32x32xf32> to vector<32x32xbf16>
    %cst_87 = arith.constant dense<0.000000e+00> : vector<32x32xf32>
    %230 = tpu.matmul %226, %229, %cst_87 {dimension_numbers = #tpu.dot_dimension_numbers<[1], [0], [0], [1], [0, 0, 1, 1], [], []>} : vector<32x32xbf16>, vector<32x32xbf16>, vector<32x32xf32> -> vector<32x32xf32>
    %c1_88 = arith.constant 1 : index
    %c0_89 = arith.constant 0 : index
    %c0_90 = arith.constant 0 : index
    %231 = vector.load %arg6[%c1_88, %c0_89, %c0_90] : memref<2x1x32xf32, #tpu.memory_space<vmem>>, vector<1x1x32xf32>
    %232 = vector.shape_cast %231 : vector<1x1x32xf32> to vector<1x32xf32>
    %233 = vector.broadcast %232 : vector<1x32xf32> to vector<32x32xf32>
    %234 = arith.addf %230, %233 : vector<32x32xf32>
    %235 = arith.addf %164, %234 : vector<32x32xf32>
    %c1_91 = arith.constant 1 : index
    %c0_92 = arith.constant 0 : index
    %c0_93 = arith.constant 0 : index
    %236 = vector.load %arg7[%c1_91, %c0_92, %c0_93] : memref<2x1x32xf32, #tpu.memory_space<vmem>>, vector<1x1x32xf32>
    %237 = vector.shape_cast %236 : vector<1x1x32xf32> to vector<1x32xf32>
    %c1_94 = arith.constant 1 : index
    %c0_95 = arith.constant 0 : index
    %c0_96 = arith.constant 0 : index
    %238 = vector.load %arg8[%c1_94, %c0_95, %c0_96] : memref<2x1x32xf32, #tpu.memory_space<vmem>>, vector<1x1x32xf32>
    %239 = vector.shape_cast %238 : vector<1x1x32xf32> to vector<1x32xf32>
    %cst_97 = arith.constant dense<0.000000e+00> : vector<32xf32>
    %240 = vector.multi_reduction <add>, %235, %cst_97 [1] : vector<32x32xf32> to vector<32xf32>
    %241 = vector.shape_cast %240 : vector<32xf32> to vector<32x1xf32>
    %cst_98 = arith.constant 3.200000e+01 : f32
    %242 = vector.broadcast %cst_98 : f32 to vector<32x1xf32>
    %243 = arith.divf %241, %242 : vector<32x1xf32>
    %244 = vector.broadcast %243 : vector<32x1xf32> to vector<32x32xf32>
    %245 = arith.subf %235, %244 : vector<32x32xf32>
    %246 = vector.broadcast %243 : vector<32x1xf32> to vector<32x32xf32>
    %247 = arith.subf %235, %246 : vector<32x32xf32>
    %248 = arith.mulf %245, %247 : vector<32x32xf32>
    %cst_99 = arith.constant dense<0.000000e+00> : vector<32xf32>
    %249 = vector.multi_reduction <add>, %248, %cst_99 [1] : vector<32x32xf32> to vector<32xf32>
    %250 = vector.shape_cast %249 : vector<32xf32> to vector<32x1xf32>
    %cst_100 = arith.constant 3.200000e+01 : f32
    %251 = vector.broadcast %cst_100 : f32 to vector<32x1xf32>
    %252 = arith.divf %250, %251 : vector<32x1xf32>
    %cst_101 = arith.constant 9.99999996E-13 : f32
    %253 = vector.broadcast %cst_101 : f32 to vector<32x1xf32>
    %254 = arith.addf %252, %253 : vector<32x1xf32>
    %255 = math.rsqrt %254 : vector<32x1xf32>
    %256 = vector.broadcast %243 : vector<32x1xf32> to vector<32x32xf32>
    %257 = arith.subf %235, %256 : vector<32x32xf32>
    %258 = vector.broadcast %255 : vector<32x1xf32> to vector<32x32xf32>
    %259 = arith.mulf %257, %258 : vector<32x32xf32>
    %260 = vector.broadcast %237 : vector<1x32xf32> to vector<32x32xf32>
    %261 = arith.mulf %259, %260 : vector<32x32xf32>
    %262 = vector.broadcast %239 : vector<1x32xf32> to vector<32x32xf32>
    %263 = arith.addf %261, %262 : vector<32x32xf32>
    %264 = arith.truncf %263 : vector<32x32xf32> to vector<32x32xbf16>
    %c1_102 = arith.constant 1 : index
    %c0_103 = arith.constant 0 : index
    %c0_104 = arith.constant 0 : index
    %265 = vector.load %arg9[%c1_102, %c0_103, %c0_104] : memref<2x32x128xf32, #tpu.memory_space<vmem>>, vector<1x32x128xf32>
    %266 = vector.shape_cast %265 : vector<1x32x128xf32> to vector<32x128xf32>
    %267 = arith.truncf %266 : vector<32x128xf32> to vector<32x128xbf16>
    %cst_105 = arith.constant dense<0.000000e+00> : vector<32x128xf32>
    %268 = tpu.matmul %264, %267, %cst_105 {dimension_numbers = #tpu.dot_dimension_numbers<[1], [0], [0], [1], [0, 0, 1, 1], [], []>} : vector<32x32xbf16>, vector<32x128xbf16>, vector<32x128xf32> -> vector<32x128xf32>
    %c1_106 = arith.constant 1 : index
    %c0_107 = arith.constant 0 : index
    %c0_108 = arith.constant 0 : index
    %269 = vector.load %arg10[%c1_106, %c0_107, %c0_108] : memref<2x1x128xf32, #tpu.memory_space<vmem>>, vector<1x1x128xf32>
    %270 = vector.shape_cast %269 : vector<1x1x128xf32> to vector<1x128xf32>
    %271 = vector.broadcast %270 : vector<1x128xf32> to vector<32x128xf32>
    %272 = arith.addf %268, %271 : vector<32x128xf32>
    %273 = arith.mulf %272, %272 : vector<32x128xf32>
    %274 = arith.mulf %272, %273 : vector<32x128xf32>
    %cst_109 = arith.constant 4.471500e-02 : f32
    %275 = vector.broadcast %cst_109 : f32 to vector<32x128xf32>
    %276 = arith.mulf %275, %274 : vector<32x128xf32>
    %277 = arith.addf %272, %276 : vector<32x128xf32>
    %cst_110 = arith.constant 0.797884583 : f32
    %278 = vector.broadcast %cst_110 : f32 to vector<32x128xf32>
    %279 = arith.mulf %278, %277 : vector<32x128xf32>
    %280 = math.tanh %279 : vector<32x128xf32>
    %cst_111 = arith.constant 1.000000e+00 : f32
    %281 = vector.broadcast %cst_111 : f32 to vector<32x128xf32>
    %282 = arith.addf %281, %280 : vector<32x128xf32>
    %cst_112 = arith.constant 5.000000e-01 : f32
    %283 = vector.broadcast %cst_112 : f32 to vector<32x128xf32>
    %284 = arith.mulf %283, %282 : vector<32x128xf32>
    %285 = arith.mulf %272, %284 : vector<32x128xf32>
    %286 = arith.truncf %285 : vector<32x128xf32> to vector<32x128xbf16>
    %c1_113 = arith.constant 1 : index
    %c0_114 = arith.constant 0 : index
    %c0_115 = arith.constant 0 : index
    %287 = vector.load %arg11[%c1_113, %c0_114, %c0_115] : memref<2x128x32xf32, #tpu.memory_space<vmem>>, vector<1x128x32xf32>
    %288 = vector.shape_cast %287 : vector<1x128x32xf32> to vector<128x32xf32>
    %289 = arith.truncf %288 : vector<128x32xf32> to vector<128x32xbf16>
    %cst_116 = arith.constant dense<0.000000e+00> : vector<32x32xf32>
    %290 = tpu.matmul %286, %289, %cst_116 {dimension_numbers = #tpu.dot_dimension_numbers<[1], [0], [0], [1], [0, 0, 1, 1], [], []>} : vector<32x128xbf16>, vector<128x32xbf16>, vector<32x32xf32> -> vector<32x32xf32>
    %c1_117 = arith.constant 1 : index
    %c0_118 = arith.constant 0 : index
    %c0_119 = arith.constant 0 : index
    %291 = vector.load %arg12[%c1_117, %c0_118, %c0_119] : memref<2x1x32xf32, #tpu.memory_space<vmem>>, vector<1x1x32xf32>
    %292 = vector.shape_cast %291 : vector<1x1x32xf32> to vector<1x32xf32>
    %293 = vector.broadcast %292 : vector<1x32xf32> to vector<32x32xf32>
    %294 = arith.addf %290, %293 : vector<32x32xf32>
    %295 = arith.addf %263, %294 : vector<32x32xf32>
    %c1_120 = arith.constant 1 : index
    %c0_121 = arith.constant 0 : index
    %c0_122 = arith.constant 0 : index
    %296 = vector.load %arg13[%c1_120, %c0_121, %c0_122] : memref<2x1x32xf32, #tpu.memory_space<vmem>>, vector<1x1x32xf32>
    %297 = vector.shape_cast %296 : vector<1x1x32xf32> to vector<1x32xf32>
    %c1_123 = arith.constant 1 : index
    %c0_124 = arith.constant 0 : index
    %c0_125 = arith.constant 0 : index
    %298 = vector.load %arg14[%c1_123, %c0_124, %c0_125] : memref<2x1x32xf32, #tpu.memory_space<vmem>>, vector<1x1x32xf32>
    %299 = vector.shape_cast %298 : vector<1x1x32xf32> to vector<1x32xf32>
    %cst_126 = arith.constant dense<0.000000e+00> : vector<32xf32>
    %300 = vector.multi_reduction <add>, %295, %cst_126 [1] : vector<32x32xf32> to vector<32xf32>
    %301 = vector.shape_cast %300 : vector<32xf32> to vector<32x1xf32>
    %cst_127 = arith.constant 3.200000e+01 : f32
    %302 = vector.broadcast %cst_127 : f32 to vector<32x1xf32>
    %303 = arith.divf %301, %302 : vector<32x1xf32>
    %304 = vector.broadcast %303 : vector<32x1xf32> to vector<32x32xf32>
    %305 = arith.subf %295, %304 : vector<32x32xf32>
    %306 = vector.broadcast %303 : vector<32x1xf32> to vector<32x32xf32>
    %307 = arith.subf %295, %306 : vector<32x32xf32>
    %308 = arith.mulf %305, %307 : vector<32x32xf32>
    %cst_128 = arith.constant dense<0.000000e+00> : vector<32xf32>
    %309 = vector.multi_reduction <add>, %308, %cst_128 [1] : vector<32x32xf32> to vector<32xf32>
    %310 = vector.shape_cast %309 : vector<32xf32> to vector<32x1xf32>
    %cst_129 = arith.constant 3.200000e+01 : f32
    %311 = vector.broadcast %cst_129 : f32 to vector<32x1xf32>
    %312 = arith.divf %310, %311 : vector<32x1xf32>
    %cst_130 = arith.constant 9.99999996E-13 : f32
    %313 = vector.broadcast %cst_130 : f32 to vector<32x1xf32>
    %314 = arith.addf %312, %313 : vector<32x1xf32>
    %315 = math.rsqrt %314 : vector<32x1xf32>
    %316 = vector.broadcast %303 : vector<32x1xf32> to vector<32x32xf32>
    %317 = arith.subf %295, %316 : vector<32x32xf32>
    %318 = vector.broadcast %315 : vector<32x1xf32> to vector<32x32xf32>
    %319 = arith.mulf %317, %318 : vector<32x32xf32>
    %320 = vector.broadcast %297 : vector<1x32xf32> to vector<32x32xf32>
    %321 = arith.mulf %319, %320 : vector<32x32xf32>
    %322 = vector.broadcast %299 : vector<1x32xf32> to vector<32x32xf32>
    %323 = arith.addf %321, %322 : vector<32x32xf32>
    %c0_131 = arith.constant 0 : index
    %c0_132 = arith.constant 0 : index
    %324 = vector.load %arg15[%c0_131, %c0_132] : memref<1x32xf32, #tpu.memory_space<vmem>>, vector<1x32xf32>
    %325 = vector.extract_strided_slice %323 {offsets = [15, 0], sizes = [1, 32], strides = [1, 1]} : vector<32x32xf32> to vector<1x32xf32>
    %326 = arith.mulf %325, %324 : vector<1x32xf32>
    %cst_133 = arith.constant dense<0.000000e+00> : vector<1xf32>
    %327 = vector.multi_reduction <add>, %326, %cst_133 [1] : vector<1x32xf32> to vector<1xf32>
    %328 = vector.shape_cast %327 : vector<1xf32> to vector<1x1xf32>
    %329 = vector.extract_strided_slice %323 {offsets = [31, 0], sizes = [1, 32], strides = [1, 1]} : vector<32x32xf32> to vector<1x32xf32>
    %330 = arith.mulf %329, %324 : vector<1x32xf32>
    %cst_134 = arith.constant dense<0.000000e+00> : vector<1xf32>
    %331 = vector.multi_reduction <add>, %330, %cst_134 [1] : vector<1x32xf32> to vector<1xf32>
    %332 = vector.shape_cast %331 : vector<1xf32> to vector<1x1xf32>
    %333 = tpu.concatenate %328, %332 in 1 : vector<1x1xf32>, vector<1x1xf32> -> vector<1x2xf32>
    %c0_135 = arith.constant 0 : index
    %c0_136 = arith.constant 0 : index
    %334 = vector.load %arg16[%c0_135, %c0_136] : memref<1x1xf32, #tpu.memory_space<vmem>>, vector<1x1xf32>
    %335 = vector.broadcast %334 : vector<1x1xf32> to vector<1x2xf32>
    %336 = arith.addf %333, %335 : vector<1x2xf32>
    %c0_137 = arith.constant 0 : index
    %c0_138 = arith.constant 0 : index
    %337 = vector.load %arg17[%c0_137, %c0_138] : memref<1x2xf32, #tpu.memory_space<vmem>>, vector<1x2xf32>
    tpu.vector_store %arg17[%c0_137, %c0_138], %336 {strides = array<i32>} : memref<1x2xf32, #tpu.memory_space<vmem>>, vector<1x2xf32>,
    return
  }
  func.func @transform_0(%arg0: i32) -> (i32, i32) {
    %c0_i32 = arith.constant 0 : i32
    %c0_i32_0 = arith.constant 0 : i32
    %c0_i32_1 = arith.constant 0 : i32
    return %c0_i32, %c0_i32_0 : i32, i32
  }
  func.func @transform_1(%arg0: i32) -> (i32, i32) {
    %c0_i32 = arith.constant 0 : i32
    %c0_i32_0 = arith.constant 0 : i32
    %c0_i32_1 = arith.constant 0 : i32
    return %c0_i32, %c0_i32_0 : i32, i32
  }
  func.func @transform_2(%arg0: i32) -> (i32, i32, i32) {
    %c0_i32 = arith.constant 0 : i32
    %c0_i32_0 = arith.constant 0 : i32
    %c0_i32_1 = arith.constant 0 : i32
    %c0_i32_2 = arith.constant 0 : i32
    return %c0_i32, %c0_i32_0, %c0_i32_1 : i32, i32, i32
  }
  func.func @transform_3(%arg0: i32) -> (i32, i32, i32) {
    %c0_i32 = arith.constant 0 : i32
    %c0_i32_0 = arith.constant 0 : i32
    %c0_i32_1 = arith.constant 0 : i32
    %c0_i32_2 = arith.constant 0 : i32
    return %c0_i32, %c0_i32_0, %c0_i32_1 : i32, i32, i32
  }
  func.func @transform_4(%arg0: i32) -> (i32, i32, i32) {
    %c0_i32 = arith.constant 0 : i32
    %c0_i32_0 = arith.constant 0 : i32
    %c0_i32_1 = arith.constant 0 : i32
    %c0_i32_2 = arith.constant 0 : i32
    return %c0_i32, %c0_i32_0, %c0_i32_1 : i32, i32, i32
  }
  func.func @transform_5(%arg0: i32) -> (i32, i32, i32) {
    %c0_i32 = arith.constant 0 : i32
    %c0_i32_0 = arith.constant 0 : i32
    %c0_i32_1 = arith.constant 0 : i32
    %c0_i32_2 = arith.constant 0 : i32
    return %c0_i32, %c0_i32_0, %c0_i32_1 : i32, i32, i32
  }
  func.func @transform_6(%arg0: i32) -> (i32, i32, i32) {
    %c0_i32 = arith.constant 0 : i32
    %c0_i32_0 = arith.constant 0 : i32
    %c0_i32_1 = arith.constant 0 : i32
    %c0_i32_2 = arith.constant 0 : i32
    return %c0_i32, %c0_i32_0, %c0_i32_1 : i32, i32, i32
  }
  func.func @transform_7(%arg0: i32) -> (i32, i32, i32) {
    %c0_i32 = arith.constant 0 : i32
    %c0_i32_0 = arith.constant 0 : i32
    %c0_i32_1 = arith.constant 0 : i32
    %c0_i32_2 = arith.constant 0 : i32
    return %c0_i32, %c0_i32_0, %c0_i32_1 : i32, i32, i32
  }
  func.func @transform_8(%arg0: i32) -> (i32, i32, i32) {
    %c0_i32 = arith.constant 0 : i32
    %c0_i32_0 = arith.constant 0 : i32
    %c0_i32_1 = arith.constant 0 : i32
    %c0_i32_2 = arith.constant 0 : i32
    return %c0_i32, %c0_i32_0, %c0_i32_1 : i32, i32, i32
  }
  func.func @transform_9(%arg0: i32) -> (i32, i32, i32) {
    %c0_i32 = arith.constant 0 : i32
    %c0_i32_0 = arith.constant 0 : i32
    %c0_i32_1 = arith.constant 0 : i32
    %c0_i32_2 = arith.constant 0 : i32
    return %c0_i32, %c0_i32_0, %c0_i32_1 : i32, i32, i32
  }
  func.func @transform_10(%arg0: i32) -> (i32, i32, i32) {
    %c0_i32 = arith.constant 0 : i32
    %c0_i32_0 = arith.constant 0 : i32
    %c0_i32_1 = arith.constant 0 : i32
    %c0_i32_2 = arith.constant 0 : i32
    return %c0_i32, %c0_i32_0, %c0_i32_1 : i32, i32, i32
  }
  func.func @transform_11(%arg0: i32) -> (i32, i32, i32) {
    %c0_i32 = arith.constant 0 : i32
    %c0_i32_0 = arith.constant 0 : i32
    %c0_i32_1 = arith.constant 0 : i32
    %c0_i32_2 = arith.constant 0 : i32
    return %c0_i32, %c0_i32_0, %c0_i32_1 : i32, i32, i32
  }
  func.func @transform_12(%arg0: i32) -> (i32, i32, i32) {
    %c0_i32 = arith.constant 0 : i32
    %c0_i32_0 = arith.constant 0 : i32
    %c0_i32_1 = arith.constant 0 : i32
    %c0_i32_2 = arith.constant 0 : i32
    return %c0_i32, %c0_i32_0, %c0_i32_1 : i32, i32, i32
  }
  func.func @transform_13(%arg0: i32) -> (i32, i32, i32) {
    %c0_i32 = arith.constant 0 : i32
    %c0_i32_0 = arith.constant 0 : i32
    %c0_i32_1 = arith.constant 0 : i32
    %c0_i32_2 = arith.constant 0 : i32
    return %c0_i32, %c0_i32_0, %c0_i32_1 : i32, i32, i32
  }
  func.func @transform_14(%arg0: i32) -> (i32, i32) {
    %c0_i32 = arith.constant 0 : i32
    %c0_i32_0 = arith.constant 0 : i32
    %c0_i32_1 = arith.constant 0 : i32
    return %c0_i32, %c0_i32_0 : i32, i32
  }
  func.func @transform_15(%arg0: i32) -> (i32, i32) {
    %c0_i32 = arith.constant 0 : i32
    %c0_i32_0 = arith.constant 0 : i32
    %c0_i32_1 = arith.constant 0 : i32
    return %c0_i32, %c0_i32_0 : i32, i32
  }
  func.func @transform_16(%arg0: i32) -> (i32, i32) {
    %c0_i32 = arith.constant 0 : i32
    %c0_i32_0 = arith.constant 0 : i32
    %c0_i32_1 = arith.constant 0 : i32
    return %c0_i32, %c0_i32_0 : i32, i32
  }
}

</mosaic_0001>

<bundles_post_ra>
// kernel: verifier_forward.1
= control target key start
LH: loop header
LB: loop body
LE: loop exit
PB: predicated region body
PF: predicated region fallthrough
CT: control target
= control target key end

     0   :  { %s1909_s0 = inlined_call_operand.vmem [shape: f32[32,32], index: 0, kind: input, shape index: {}]   ;;  %s1910_s1 = inlined_call_operand.vmem [shape: f32[2,16], index: 1, kind: input, shape index: {}]   ;;  %s1911_s2 = inlined_call_operand.vmem [shape: f32[2,32,96], index: 2, kind: input, shape index: {}]   ;;  %s1912_s3 = inlined_call_operand.vmem [shape: f32[2,1,96], index: 3, kind: input, shape index: {}]   ;;  %s1913_s4 = inlined_call_operand.vmem [shape: f32[2,32,32], index: 4, kind: input, shape index: {}]   ;;  %s1914_s5 = inlined_call_operand.vmem [shape: f32[2,1,32], index: 5, kind: input, shape index: {}]   ;;  %s1915_s6 = inlined_call_operand.vmem [shape: f32[2,1,32], index: 6, kind: input, shape index: {}]   ;;  %s1916_s7 = inlined_call_operand.vmem [shape: f32[2,1,32], index: 7, kind: input, shape index: {}]   ;;  %s1917_s8 = inlined_call_operand.vmem [shape: f32[2,32,128], index: 8, kind: input, shape index: {}]   ;;  %s1918_s9 = inlined_call_operand.vmem [shape: f32[2,1,128], index: 9, kind: input, shape index: {}]   ;;  %s1919_s10 = inlined_call_operand.vmem [shape: f32[2,128,32], index: 10, kind: input, shape index: {}]   ;;  %s1920_s11 = inlined_call_operand.vmem [shape: f32[2,1,32], index: 11, kind: input, shape index: {}]   ;;  %s1921_s12 = inlined_call_operand.vmem [shape: f32[2,1,32], index: 12, kind: input, shape index: {}]   ;;  %s1922_s13 = inlined_call_operand.vmem [shape: f32[2,1,32], index: 13, kind: input, shape index: {}]   ;;  %s1923_s14 = inlined_call_operand.vmem [shape: f32[1,32], index: 14, kind: input, shape index: {}]   ;;  %s1924_s15 = inlined_call_operand.<no memory space> [shape: f32[1,1], index: 15, kind: input, shape index: {}]   ;;  %s1925_s16 = inlined_call_operand.hbm [shape: f32[1,2], index: 16, kind: output, shape index: {}]  }
   0x1   :  { %1927 = sst [smem:[#allocation6_spill]] %s1909_s0  ;;  %v21_v0 = vstv %s1924_s15 }
   0x2   :  { %22 = vst [vmem:[#allocation2] sm:$0x1] %v21_v0 }
   0x3   :  { %v68_v1 = vld [vmem:[%s1911_s2 + $0x10] sm:$0xff]  ;;  %v69_v2 = vld [vmem:[%s1911_s2 + $0x18] sm:$0xff]  ;;  %v66_v3 = vld [vmem:[%s1911_s2] sm:$0xff]  ;;  %s1928_s17 = sld [smem:[#allocation6_spill]]  ;;  %vm76_vm0 = vcmask 261120  }
   0x4   :  { %v71_v4 = vpack.c.bf16 %v69_v2, %v68_v1  ;;  %v67_v5 = vld [vmem:[%s1911_s2 + $0x8] sm:$0xff] }
   0x5   :  { %v70_v7 = vpack.c.bf16 %v67_v5, %v66_v3 }
   0x6   :  { %89 = vmatpush.bf16.msra.mxu0 %v71_v4 }
   0x9   :  { %v1476_v6 = vld [vmem:[%s1928_s17] sm:$0xff]  ;;  %v1481_v8 = vld [vmem:[%s1928_s17 + $0x8] sm:$0xff] }
   0xa   :  { %v64_v9 = vpack.c.bf16 %v1481_v8, %v1476_v6  ;;  %90 = vmatpush.bf16.msra.mxu0 %v70_v7 }
   0xb   :  { %23 = vsyncpa [#allocation4], 0  ;;  %v1489_v10 = vld [vmem:[%s1928_s17 + $0x10] sm:$0xff]  ;;  %v1494_v11 = vld [vmem:[%s1928_s17 + $0x18] sm:$0xff]  ;;  %s1368_s26 = smov 96   ;;  %vm131_vm1 = vcmask 130048  }
   0xc   :  { %v65_v12 = vpack.c.bf16 %v1494_v11, %v1489_v10  ;;  %v1247_v14 = vld [vmem:[%s1912_s3] ss:$0 sm:$0xff]  ;;  %s1175_s18 = sshll.u32 %s1925_s16, 4  ;;  %s1176_s18 = int_to_ptr.hbm [resolvable:$true] %s1175_s18 }
   0xd   :  { %1184 = vmatmul.msk.bf16.vlgmr.msra.gmra.mxu0 %vm76_vm0, %v64_v9  ;;  %v61_v28 = vld [vmem:[%s1910_s1] sm:$0x3]  ;;  %s1369_s1 = smov 64  }
   0xe   :  { %v62_v29 = vsub.f32 1.0, %v61_v28  ;;  %v249_v28 = vld [vmem:[%s1913_s4] sm:$0xff] }
  0x10   :  { %v63_v30 = vmul.f32 -1e+09, %v62_v29  ;;  %v250_v29 = vld [vmem:[%s1913_s4 + $0x8] sm:$0xff] }
  0x12   :  { %v1515_v31 = vperm.slane %v63_v30, 0  ;;  %v1521_v40 = vperm.slane %v63_v30, 1  ;;  %v253_v30 = vpack.c.bf16 %v250_v29, %v249_v28 }
  0x1d   :  { %1185 = vmatmul.msk.bf16.gmra.mxu0 %vm76_vm0, %v65_v12 }
  0x8a   :  { %v92_v13 = vpop.f32.mrf.mxu0 }
  0x8b   :  { %v93_v16 = vadd.f32 %v1247_v14, %v92_v13 }
  0x92   :  { %v94_v15 = vpop.f32.mrf.mxu0 }
  0x93   :  { %v95_v17 = vadd.f32 %v1247_v14, %v94_v15 }
  0x95   :  { %v102_v18 = vpack.c.bf16 %v95_v17, %v93_v16 }
  0x97   :  { %104 = vrot.lane.b32.xlu0 %v102_v18, %s1368_s26 }
  0x9a   :  { %v97_v19 = vpop.f32.mrf.mxu0 }
  0x9b   :  { %v98_v20 = vadd.f32 %v1247_v14, %v97_v19 }
  0xa2   :  { %v99_v21 = vpop.f32.mrf.mxu0 }
  0xa3   :  { %v100_v22 = vadd.f32 %v1247_v14, %v99_v21 }
  0xa5   :  { %v1503_v23 = vpack.c.bf16 %v100_v22, %v98_v20 }
  0xa7   :  { %177 = vrot.lane.b32.xlu0 %v1503_v23, %s1368_s26 }
 0x109   :  { %v105_v24 = vpop.permute.xlu0 %104 }
 0x10a   :  { %v110_v25 = vsel %vm76_vm0, %v105_v24, 0 }
 0x10b   :  { %119 = vmatpush.bf16.xpose.msra.mxu1 %v110_v25  ;;  %v251_v25 = vld [vmem:[%s1913_s4 + $0x10] sm:$0xff] }
 0x112   :  { %1186 = vmatmul.msk.bf16.vlgmr.msra.gmra.mxu1 %vm76_vm0, %v102_v18 }
 0x119   :  { %v178_v26 = vpop.permute.xlu0 %177 }
 0x11a   :  { %v183_v27 = vsel %vm76_vm0, %v178_v26, 0  ;;  %v252_v26 = vld [vmem:[%s1913_s4 + $0x18] sm:$0xff] }
 0x11b   :  { %192 = vmatpush.bf16.xpose.msra.mxu3 %v183_v27  ;;  %v254_v27 = vpack.c.bf16 %v252_v26, %v251_v25 }
 0x11d   :  { %271 = vmatpush.bf16.msrb.mxu1 %v254_v27 }
 0x121   :  { %272 = vmatpush.bf16.msrb.mxu1 %v253_v30 }
 0x122   :  { %1188 = vmatmul.msk.bf16.vlgmr.msra.gmra.mxu3 %vm76_vm0, %v1503_v23 }
 0x18f   :  { %v121_v32 = vpop.f32.mrf.mxu1 }
 0x190   :  { %v126_v33 = vmul.f32 0.17677669, %v121_v32 }
 0x192   :  { %v129_v34 = vadd.f32 %v1515_v31, %v126_v33 }
 0x194   :  { %v132_v35 = vsel %vm131_vm1, %v129_v34, -inf }
 0x195   :  { %133 = vmax.xlane.f32.xlu1 %v132_v35 }
 0x197   :  { %v123_v36 = vpop.f32.mrf.mxu1 }
 0x198   :  { %v127_v37 = vmul.f32 0.17677669, %v123_v36 }
 0x19a   :  { %v130_v38 = vadd.f32 %v1515_v31, %v127_v37 }
 0x19c   :  { %v135_v39 = vsel %vm131_vm1, %v130_v38, -inf }
 0x19d   :  { %136 = vmax.xlane.f32.xlu1 %v135_v39 }
 0x1a5   :  { %v194_v41 = vpop.f32.mrf.mxu3 }
 0x1a6   :  { %v199_v42 = vmul.f32 0.17677669, %v194_v41 }
 0x1a8   :  { %v202_v43 = vadd.f32 %v1521_v40, %v199_v42 }
 0x1aa   :  { %v204_v44 = vsel %vm131_vm1, %v202_v43, -inf }
 0x1ab   :  { %205 = vmax.xlane.f32.xlu2 %v204_v44 }
 0x1ad   :  { %v196_v45 = vpop.f32.mrf.mxu3 }
 0x1ae   :  { %v200_v46 = vmul.f32 0.17677669, %v196_v45 }
 0x1b0   :  { %v203_v47 = vadd.f32 %v1521_v40, %v200_v46 }
 0x1b2   :  { %v207_v48 = vsel %vm131_vm1, %v203_v47, -inf }
 0x1b3   :  { %208 = vmax.xlane.f32.xlu2 %v207_v48 }
 0x1cb   :  { %155 = vrot.lane.b32.xlu2 %v102_v18, %s1369_s1 }
 0x208   :  { %v134_v49 = vpop.xlane.xlu1 %133 }
 0x209   :  { %v138_v50 = vsub.f32 %v129_v34, %v134_v49 }
 0x20b   :  { %v140_v51 = vmul.f32 1.442695, %v138_v50 }
 0x20d   :  { %1264 = vpow2.f32 %v140_v51 }
 0x210   :  { %v137_v52 = vpop.xlane.xlu1 %136 }
 0x211   :  { %v139_v53 = vsub.f32 %v130_v38, %v137_v52  ;;  %v1248_v38 = vld [vmem:[%s1914_s5] ss:$0 sm:$0xff] }
 0x213   :  { %v1265_v54 = vpop.eup %1264  ;;  %v142_v55 = vmul.f32 1.442695, %v139_v53 }
 0x214   :  { %v144_v56 = vsel %vm131_vm1, %v1265_v54, 0.0 }
 0x215   :  { %1266 = vpow2.f32 %v142_v55  ;;  %145 = vadd.xlane.f32.xlu0 %v144_v56  ;;  %v1370_v55 = vmov 32.0  }
 0x21b   :  { %v1267_v57 = vpop.eup %1266 }
 0x21c   :  { %v147_v58 = vsel %vm131_vm1, %v1267_v57, 0.0 }
 0x21d   :  { %148 = vadd.xlane.f32.xlu1 %v147_v58 }
 0x21e   :  { %v206_v59 = vpop.xlane.xlu2 %205 }
 0x21f   :  { %v210_v60 = vsub.f32 %v202_v43, %v206_v59 }
 0x221   :  { %v212_v61 = vmul.f32 1.442695, %v210_v60 }
 0x223   :  { %1268 = vpow2.f32 %v212_v61 }
 0x226   :  { %v209_v62 = vpop.xlane.xlu2 %208 }
 0x227   :  { %v211_v63 = vsub.f32 %v203_v47, %v209_v62 }
 0x229   :  { %v1269_v0 = vpop.eup %1268  ;;  %v214_v1 = vmul.f32 1.442695, %v211_v63 }
 0x22a   :  { %v216_v2 = vsel %vm131_vm1, %v1269_v0, 0.0 }
 0x22b   :  { %1270 = vpow2.f32 %v214_v1  ;;  %217 = vadd.xlane.f32.xlu1 %v216_v2 }
 0x22e   :  { %v156_v3 = vpop.permute.xlu2 %155 }
 0x22f   :  { %168 = vmatpush.bf16.msra.mxu2 %v156_v3 }
 0x231   :  { %v1271_v4 = vpop.eup %1270 }
 0x232   :  { %v219_v5 = vsel %vm131_vm1, %v1271_v4, 0.0 }
 0x233   :  { %220 = vadd.xlane.f32.xlu1 %v219_v5 }
 0x24c   :  { %227 = vrot.lane.b32.xlu1 %v1503_v23, %s1369_s1 }
 0x288   :  { %v146_v7 = vpop.xlane.xlu0 %145 }
 0x289   :  { %1272 = vrcp.f32 %v146_v7 }
 0x28f   :  { %v1273_v12 = vpop.eup %1272 }
 0x290   :  { %v149_v9 = vpop.xlane.xlu1 %148  ;;  %v152_v14 = vmul.f32 %v1273_v12, %v1265_v54 }
 0x291   :  { %1274 = vrcp.f32 %v149_v9 }
 0x297   :  { %v1275_v13 = vpop.eup %1274 }
 0x298   :  { %v153_v15 = vmul.f32 %v1275_v13, %v1267_v57 }
 0x29a   :  { %v154_v16 = vpack.c.bf16 %v153_v15, %v152_v14 }
 0x29c   :  { %1187 = vmatmul.msk.bf16.vlgmr.msra.gmra.mxu2 %vm131_vm1, %v154_v16 }
 0x29e   :  { %v218_v17 = vpop.xlane.xlu1 %217 }
 0x2a6   :  { %v221_v18 = vpop.xlane.xlu1 %220 }
 0x2a7   :  { %1276 = vrcp.f32 %v221_v18 }
 0x2a8   :  { %1278 = vrcp.f32 %v218_v17 }
 0x2a9   :  { %1280 = vrcp.f32 %v1370_v55 }
 0x2ad   :  { %v1277_v19 = vpop.eup %1276 }
 0x2ae   :  { %v1279_v20 = vpop.eup %1278  ;;  %v225_v21 = vmul.f32 %v1277_v19, %v1271_v4  ;;  %v403_v19 = vld [vmem:[%s1917_s8 + $0x10] sm:$0xff] }
 0x2af   :  { %v224_v22 = vmul.f32 %v1279_v20, %v1269_v0  ;;  %v404_v20 = vld [vmem:[%s1917_s8 + $0x18] sm:$0xff] }
 0x2b1   :  { %v226_v24 = vpack.c.bf16 %v225_v21, %v224_v22  ;;  %v406_v21 = vpack.c.bf16 %v404_v20, %v403_v19  ;;  %v401_v22 = vld [vmem:[%s1917_s8] sm:$0xff] }
 0x2b3   :  { %423 = vmatpush.bf16.msrb.mxu3 %v406_v21 }
 0x2be   :  { %v228_v23 = vpop.permute.xlu1 %227 }
 0x2bf   :  { %240 = vmatpush.bf16.msrb.mxu2 %v228_v23  ;;  %v402_v23 = vld [vmem:[%s1917_s8 + $0x8] sm:$0xff] }
 0x2c0   :  { %v405_v25 = vpack.c.bf16 %v402_v23, %v401_v22  ;;  %v489_v22 = vld [vmem:[%s1919_s10 + $0x78] sm:$0xff]  ;;  %v486_v23 = vld [vmem:[%s1919_s10 + $0x60] sm:$0xff] }
 0x2c2   :  { %1189 = vmatmul.msk.bf16.vlgmr.msrb.gmra.mxu2 %vm131_vm1, %v226_v24  ;;  %424 = vmatpush.bf16.msrb.mxu3 %v405_v25 }
 0x31f   :  { %v170_v32 = vpop.f32.mrf.mxu2 }
 0x327   :  { %v172_v33 = vpop.f32.mrf.mxu2 }
 0x328   :  { %v247_v34 = vpack.c.bf16 %v172_v33, %v170_v32 }
 0x32a   :  { %1190 = vmatmul.msk.bf16.vlgmr.msrb.gmra.mxu1 %vm76_vm0, %v247_v34 }
 0x345   :  { %v242_v35 = vpop.f32.mrf.mxu2 }
 0x34d   :  { %v244_v36 = vpop.f32.mrf.mxu2 }
 0x34e   :  { %v248_v37 = vpack.c.bf16 %v244_v36, %v242_v35 }
 0x350   :  { %1191 = vmatmul.msk.bf16.gmra.mxu1 %vm76_vm0, %v248_v37 }
 0x3a7   :  { %v274_v39 = vpop.f32.mrf.mxu1 }
 0x3a8   :  { %v275_v41 = vadd.f32 %v1248_v38, %v274_v39 }
 0x3aa   :  { %v284_v42 = vadd.f32 %v275_v41, %v1476_v6 }
 0x3ac   :  { %v290_v43 = vsel %vm76_vm0, %v284_v42, 0.0 }
 0x3ad   :  { %291 = vadd.xlane.f32.xlu2 %v290_v43 }
 0x3af   :  { %v276_v44 = vpop.f32.mrf.mxu1 }
 0x3b0   :  { %v277_v45 = vadd.f32 %v1248_v38, %v276_v44 }
 0x3b2   :  { %v285_v46 = vadd.f32 %v277_v45, %v1481_v8  ;;  %v1281_v8 = vpop.eup %1280 }
 0x3b3   :  { %v303_v56 = vmul.f32 32.0, %v1281_v8  ;;  %vm307_vm2 = vweird.f32 %v1281_v8 }
 0x3b4   :  { %v293_v47 = vsel %vm76_vm0, %v285_v46, 0.0 }
 0x3b5   :  { %294 = vadd.xlane.f32.xlu0 %v293_v47  ;;  %v304_v57 = vsub.f32 1.0, %v303_v56 }
 0x3b7   :  { %v305_v58 = vmul.f32 %v1281_v8, %v304_v57 }
 0x3b9   :  { %v306_v59 = vadd.f32 %v1281_v8, %v305_v58 }
 0x3bb   :  { %v1561_v60 = vsel %vm307_vm2, %v1281_v8, %v306_v59 }
 0x3cd   :  { %v279_v48 = vpop.f32.mrf.mxu1 }
 0x3ce   :  { %v280_v49 = vadd.f32 %v1248_v38, %v279_v48 }
 0x3d0   :  { %v286_v50 = vadd.f32 %v280_v49, %v1489_v10 }
 0x3d2   :  { %v296_v51 = vsel %vm76_vm0, %v286_v50, 0.0 }
 0x3d3   :  { %297 = vadd.xlane.f32.xlu1 %v296_v51  ;;  %v1250_v51 = vld [vmem:[%s1916_s7] ss:$0 sm:$0xff] }
 0x3d5   :  { %v281_v52 = vpop.f32.mrf.mxu1 }
 0x3d6   :  { %v282_v53 = vadd.f32 %v1248_v38, %v281_v52 }
 0x3d8   :  { %v287_v6 = vadd.f32 %v282_v53, %v1494_v11 }
 0x3da   :  { %v299_v54 = vsel %vm76_vm0, %v287_v6, 0.0 }
 0x3db   :  { %300 = vadd.xlane.f32.xlu0 %v299_v54 }
 0x420   :  { %v292_v10 = vpop.xlane.xlu2 %291 }
 0x421   :  { %v309_v61 = vmul.f32 %v1561_v60, %v292_v10 }
 0x423   :  { %v313_v62 = vsub.f32 %v284_v42, %v309_v61 }
 0x425   :  { %v317_v63 = vmul.f32 %v313_v62, %v313_v62 }
 0x427   :  { %v321_v11 = vsel %vm76_vm0, %v317_v63, 0.0 }
 0x428   :  { %v295_v0 = vpop.xlane.xlu0 %294  ;;  %322 = vadd.xlane.f32.xlu0 %v321_v11 }
 0x429   :  { %v310_v1 = vmul.f32 %v1561_v60, %v295_v0 }
 0x42b   :  { %v314_v2 = vsub.f32 %v285_v46, %v310_v1  ;;  %v1249_v46 = vld [vmem:[%s1915_s6] ss:$0 sm:$0xff] }
 0x42d   :  { %v318_v3 = vmul.f32 %v314_v2, %v314_v2 }
 0x42f   :  { %v324_v4 = vsel %vm76_vm0, %v318_v3, 0.0 }
 0x430   :  { %325 = vadd.xlane.f32.xlu2 %v324_v4 }
 0x446   :  { %v298_v5 = vpop.xlane.xlu1 %297 }
 0x447   :  { %v311_v7 = vmul.f32 %v1561_v60, %v298_v5 }
 0x449   :  { %v1568_v9 = vsub.f32 %v286_v50, %v311_v7 }
 0x44b   :  { %v319_v12 = vmul.f32 %v1568_v9, %v1568_v9 }
 0x44d   :  { %v327_v13 = vsel %vm76_vm0, %v319_v12, 0.0 }
 0x44e   :  { %v301_v14 = vpop.xlane.xlu0 %300  ;;  %328 = vadd.xlane.f32.xlu0 %v327_v13 }
 0x44f   :  { %v312_v15 = vmul.f32 %v1561_v60, %v301_v14 }
 0x451   :  { %v1574_v16 = vsub.f32 %v287_v6, %v312_v15 }
 0x453   :  { %v320_v17 = vmul.f32 %v1574_v16, %v1574_v16 }
 0x455   :  { %v330_v18 = vsel %vm76_vm0, %v320_v17, 0.0 }
 0x456   :  { %331 = vadd.xlane.f32.xlu2 %v330_v18 }
 0x49b   :  { %v323_v24 = vpop.xlane.xlu0 %322 }
 0x49c   :  { %v333_v26 = vmul.f32 %v323_v24, %v1561_v60  ;;  %v487_v24 = vld [vmem:[%s1919_s10 + $0x68] sm:$0xff] }
 0x49d   :  { %v496_v25 = vpack.c.bf16 %v487_v24, %v486_v23 }
 0x49e   :  { %v337_v27 = vadd.f32 1e-12, %v333_v26  ;;  %v484_v26 = vld [vmem:[%s1919_s10 + $0x50] sm:$0xff] }
 0x4a0   :  { %1282 = vrsqrt.f32 %v337_v27  ;;  %vm347_vm4 = vweird.f32 %v337_v27 }
 0x4a3   :  { %v326_v28 = vpop.xlane.xlu2 %325 }
 0x4a4   :  { %v334_v29 = vmul.f32 %v326_v28, %v1561_v60 }
 0x4a6   :  { %v1283_v30 = vpop.eup %1282  ;;  %v338_v32 = vadd.f32 1e-12, %v334_v29  ;;  %v482_v29 = vld [vmem:[%s1919_s10 + $0x40] sm:$0xff] }
 0x4a7   :  { %v342_v33 = vmul.f32 %v1283_v30, %v337_v27  ;;  %vm348_vm3 = vweird.f32 %v1283_v30  ;;  %v485_v27 = vld [vmem:[%s1919_s10 + $0x58] sm:$0xff] }
 0x4a8   :  { %1284 = vrsqrt.f32 %v338_v32  ;;  %vm349_vm5 = vmor %vm347_vm4, %vm348_vm3  ;;  %vm357_vm7 = vweird.f32 %v338_v32  ;;  %v495_v28 = vpack.c.bf16 %v485_v27, %v484_v26 }
 0x4a9   :  { %v343_v34 = vmul.f32 %v1283_v30, %v342_v33  ;;  %v480_v33 = vld [vmem:[%s1919_s10 + $0x30] sm:$0xff] }
 0x4ab   :  { %v344_v35 = vmul.f32 0.5, %v343_v34  ;;  %v481_v34 = vld [vmem:[%s1919_s10 + $0x38] sm:$0xff] }
 0x4ad   :  { %v345_v36 = vsub.f32 1.5, %v344_v35  ;;  %v493_v35 = vpack.c.bf16 %v481_v34, %v480_v33 }
 0x4ae   :  { %v1285_v37 = vpop.eup %1284 }
 0x4af   :  { %v346_v38 = vmul.f32 %v1283_v30, %v345_v36  ;;  %v352_v39 = vmul.f32 %v1285_v37, %v338_v32  ;;  %vm358_vm6 = vweird.f32 %v1285_v37  ;;  %v478_v36 = vld [vmem:[%s1919_s10 + $0x20] sm:$0xff] }
 0x4b0   :  { %vm359_vm8 = vmor %vm357_vm7, %vm358_vm6 }
 0x4b1   :  { %v353_v41 = vmul.f32 %v1285_v37, %v352_v39  ;;  %v350_v42 = vsel %vm349_vm5, %v1283_v30, %v346_v38  ;;  %v483_v30 = vld [vmem:[%s1919_s10 + $0x48] sm:$0xff]  ;;  %v476_v39 = vld [vmem:[%s1919_s10 + $0x10] sm:$0xff] }
 0x4b2   :  { %v381_v45 = vmul.f32 %v350_v42, %v313_v62  ;;  %v494_v32 = vpack.c.bf16 %v483_v30, %v482_v29 }
 0x4b3   :  { %v354_v43 = vmul.f32 0.5, %v353_v41  ;;  %v477_v41 = vld [vmem:[%s1919_s10 + $0x18] sm:$0xff] }
 0x4b4   :  { %v388_v50 = vmul.f32 %v1249_v46, %v381_v45  ;;  %v491_v42 = vpack.c.bf16 %v477_v41, %v476_v39  ;;  %v1251_v45 = vld [vmem:[%s1918_s9] ss:$0 sm:$0xff] }
 0x4b5   :  { %v355_v44 = vsub.f32 1.5, %v354_v43  ;;  %v474_v43 = vld [vmem:[%s1919_s10] sm:$0xff] }
 0x4b6   :  { %v1599_v53 = vadd.f32 %v1250_v51, %v388_v50 }
 0x4b7   :  { %v356_v47 = vmul.f32 %v1285_v37, %v355_v44  ;;  %v475_v44 = vld [vmem:[%s1919_s10 + $0x8] sm:$0xff] }
 0x4b9   :  { %v360_v48 = vsel %vm359_vm8, %v1285_v37, %v356_v47  ;;  %v479_v37 = vld [vmem:[%s1919_s10 + $0x28] sm:$0xff] }
 0x4ba   :  { %v382_v49 = vmul.f32 %v360_v48, %v314_v2  ;;  %v492_v38 = vpack.c.bf16 %v479_v37, %v478_v36 }
 0x4bc   :  { %v389_v52 = vmul.f32 %v1249_v46, %v382_v49 }
 0x4be   :  { %v1601_v6 = vadd.f32 %v1250_v51, %v389_v52 }
 0x4c0   :  { %v399_v54 = vpack.c.bf16 %v1601_v6, %v1599_v53 }
 0x4c1   :  { %v329_v55 = vpop.xlane.xlu0 %328 }
 0x4c2   :  { %v335_v8 = vmul.f32 %v329_v55, %v1561_v60  ;;  %1192 = vmatmul.msk.bf16.vlgmr.msrb.gmra.mxu3 %vm76_vm0, %v399_v54 }
 0x4c4   :  { %v339_v56 = vadd.f32 1e-12, %v335_v8 }
 0x4c6   :  { %1286 = vrsqrt.f32 %v339_v56  ;;  %vm367_vm10 = vweird.f32 %v339_v56 }
 0x4c9   :  { %v332_v57 = vpop.xlane.xlu2 %331 }
 0x4ca   :  { %v336_v58 = vmul.f32 %v332_v57, %v1561_v60 }
 0x4cc   :  { %v1287_v59 = vpop.eup %1286  ;;  %v340_v10 = vadd.f32 1e-12, %v336_v58 }
 0x4cd   :  { %v362_v61 = vmul.f32 %v1287_v59, %v339_v56  ;;  %vm368_vm9 = vweird.f32 %v1287_v59 }
 0x4ce   :  { %1288 = vrsqrt.f32 %v340_v10  ;;  %vm369_vm11 = vmor %vm367_vm10, %vm368_vm9  ;;  %vm377_vm13 = vweird.f32 %v340_v10 }
 0x4cf   :  { %v363_v62 = vmul.f32 %v1287_v59, %v362_v61 }
 0x4d1   :  { %v364_v63 = vmul.f32 0.5, %v363_v62 }
 0x4d3   :  { %v365_v11 = vsub.f32 1.5, %v364_v63 }
 0x4d4   :  { %v1289_v0 = vpop.eup %1288 }
 0x4d5   :  { %v366_v1 = vmul.f32 %v1287_v59, %v365_v11  ;;  %v372_v2 = vmul.f32 %v1289_v0, %v340_v10  ;;  %vm378_vm12 = vweird.f32 %v1289_v0 }
 0x4d6   :  { %vm379_vm14 = vmor %vm377_vm13, %vm378_vm12 }
 0x4d7   :  { %v373_v3 = vmul.f32 %v1289_v0, %v372_v2  ;;  %v370_v4 = vsel %vm369_vm11, %v1287_v59, %v366_v1 }
 0x4d8   :  { %v383_v12 = vmul.f32 %v370_v4, %v1568_v9  ;;  %v488_v9 = vld [vmem:[%s1919_s10 + $0x70] sm:$0xff] }
 0x4d9   :  { %v374_v5 = vmul.f32 0.5, %v373_v3 }
 0x4da   :  { %v390_v17 = vmul.f32 %v1249_v46, %v383_v12 }
 0x4db   :  { %v375_v7 = vsub.f32 1.5, %v374_v5 }
 0x4dc   :  { %v1610_v19 = vadd.f32 %v1250_v51, %v390_v17 }
 0x4dd   :  { %v376_v13 = vmul.f32 %v1289_v0, %v375_v7 }
 0x4df   :  { %v380_v14 = vsel %vm379_vm14, %v1289_v0, %v376_v13 }
 0x4e0   :  { %v384_v15 = vmul.f32 %v380_v14, %v1574_v16  ;;  %v497_v16 = vpack.c.bf16 %v489_v22, %v488_v9 }
 0x4e2   :  { %v391_v18 = vmul.f32 %v1249_v46, %v384_v15  ;;  %502 = vmatpush.bf16.msrb.mxu0 %v497_v16  ;;  %v490_v46 = vpack.c.bf16 %v475_v44, %v474_v43 }
 0x4e4   :  { %v1612_v20 = vadd.f32 %v1250_v51, %v391_v18 }
 0x4e6   :  { %v400_v21 = vpack.c.bf16 %v1612_v20, %v1610_v19  ;;  %503 = vmatpush.bf16.msrb.mxu0 %v496_v25 }
 0x4e8   :  { %1193 = vmatmul.msk.bf16.gmra.mxu3 %vm76_vm0, %v400_v21 }
 0x4ea   :  { %504 = vmatpush.bf16.msrb.mxu0 %v495_v28 }
 0x4ee   :  { %505 = vmatpush.bf16.msrb.mxu0 %v494_v32 }
 0x4f2   :  { %506 = vmatpush.bf16.msrb.mxu0 %v493_v35  ;;  %v1252_v35 = vld [vmem:[%s1920_s11] ss:$0 sm:$0xff] }
 0x4f6   :  { %507 = vmatpush.bf16.msrb.mxu0 %v492_v38 }
 0x4fa   :  { %508 = vmatpush.bf16.msrb.mxu0 %v491_v42 }
 0x4fe   :  { %509 = vmatpush.bf16.msrb.mxu0 %v490_v46 }
 0x545   :  { %v426_v47 = vpop.f32.mrf.mxu3 }
 0x546   :  { %v427_v48 = vadd.f32 %v1251_v45, %v426_v47 }
 0x548   :  { %v436_v49 = vmul.f32 %v427_v48, %v427_v48 }
 0x54a   :  { %v440_v50 = vmul.f32 %v436_v49, %v427_v48 }
 0x54c   :  { %v444_v51 = vmul.f32 0.044715, %v440_v50 }
 0x54d   :  { %v428_v52 = vpop.f32.mrf.mxu3 }
 0x54e   :  { %v448_v54 = vadd.f32 %v444_v51, %v427_v48  ;;  %v429_v55 = vadd.f32 %v1251_v45, %v428_v52 }
 0x550   :  { %v452_v8 = vmul.f32 0.7978846, %v448_v54  ;;  %v437_v56 = vmul.f32 %v429_v55, %v429_v55 }
 0x552   :  { %v441_v57 = vmul.f32 %v437_v56, %v429_v55  ;;  %1290 = vtanh.f32 %v452_v8 }
 0x554   :  { %v445_v58 = vmul.f32 0.044715, %v441_v57 }
 0x556   :  { %v449_v59 = vadd.f32 %v445_v58, %v429_v55 }
 0x558   :  { %v453_v10 = vmul.f32 0.7978846, %v449_v59  ;;  %v1291_v61 = vpop.eup %1290 }
 0x559   :  { %v460_v62 = vadd.f32 1.0, %v1291_v61 }
 0x55a   :  { %1292 = vtanh.f32 %v453_v10 }
 0x55b   :  { %v464_v0 = vmul.f32 0.5, %v460_v62 }
 0x55d   :  { %v468_v2 = vmul.f32 %v464_v0, %v427_v48 }
 0x560   :  { %v1293_v63 = vpop.eup %1292 }
 0x561   :  { %v461_v11 = vadd.f32 1.0, %v1293_v63 }
 0x563   :  { %v465_v1 = vmul.f32 0.5, %v461_v11 }
 0x565   :  { %v469_v3 = vmul.f32 %v465_v1, %v429_v55 }
 0x567   :  { %v472_v4 = vpack.c.bf16 %v469_v3, %v468_v2 }
 0x569   :  { %510 = vmatmul.bf16.vlgmr.msrb.gmra.mxu0 %v472_v4  ;;  %v1196_v4 = vld [vmem:[%s1911_s2 + $0x30] sm:$0xff] }
 0x56b   :  { %v431_v5 = vpop.f32.mrf.mxu3 }
 0x56c   :  { %v432_v7 = vadd.f32 %v1251_v45, %v431_v5  ;;  %v1197_v5 = vld [vmem:[%s1911_s2 + $0x38] sm:$0xff] }
 0x56e   :  { %v438_v12 = vmul.f32 %v432_v7, %v432_v7 }
 0x570   :  { %v442_v13 = vmul.f32 %v438_v12, %v432_v7 }
 0x572   :  { %v446_v14 = vmul.f32 0.044715, %v442_v13 }
 0x573   :  { %v433_v15 = vpop.f32.mrf.mxu3 }
 0x574   :  { %v450_v17 = vadd.f32 %v446_v14, %v432_v7  ;;  %v434_v18 = vadd.f32 %v1251_v45, %v433_v15  ;;  %v1194_v14 = vld [vmem:[%s1911_s2 + $0x20] sm:$0xff]  ;;  %v1195_v15 = vld [vmem:[%s1911_s2 + $0x28] sm:$0xff] }
 0x576   :  { %v439_v21 = vmul.f32 %v434_v18, %v434_v18  ;;  %v454_v9 = vmul.f32 0.7978846, %v450_v17  ;;  %v636_v17 = vpack.c.bf16 %v1195_v15, %v1194_v14 }
 0x578   :  { %v443_v22 = vmul.f32 %v439_v21, %v434_v18  ;;  %1294 = vtanh.f32 %v454_v9 }
 0x57a   :  { %v447_v16 = vmul.f32 0.044715, %v443_v22 }
 0x57c   :  { %v451_v23 = vadd.f32 %v447_v16, %v434_v18 }
 0x57e   :  { %v455_v24 = vmul.f32 0.7978846, %v451_v23  ;;  %v1295_v25 = vpop.eup %1294 }
 0x57f   :  { %v462_v26 = vadd.f32 1.0, %v1295_v25 }
 0x580   :  { %1296 = vtanh.f32 %v455_v24 }
 0x581   :  { %v466_v29 = vmul.f32 0.5, %v462_v26 }
 0x583   :  { %v470_v32 = vmul.f32 %v466_v29, %v432_v7  ;;  %v637_v7 = vpack.c.bf16 %v1197_v5, %v1196_v4 }
 0x585   :  { %655 = vmatpush.bf16.msra.mxu2 %v637_v7 }
 0x586   :  { %v1297_v27 = vpop.eup %1296 }
 0x587   :  { %v463_v28 = vadd.f32 1.0, %v1297_v27 }
 0x589   :  { %v467_v30 = vmul.f32 0.5, %v463_v28  ;;  %656 = vmatpush.bf16.msra.mxu2 %v636_v17 }
 0x58b   :  { %v471_v33 = vmul.f32 %v467_v30, %v434_v18 }
 0x58d   :  { %v473_v34 = vpack.c.bf16 %v471_v33, %v470_v32 }
 0x58f   :  { %515 = vmatmul.bf16.gmra.mxu0 %v473_v34 }
 0x5e6   :  { %v511_v36 = vpop.f32.mrf.mxu0 }
 0x5e7   :  { %v512_v37 = vadd.f32 %v1252_v35, %v511_v36 }
 0x5e9   :  { %v521_v38 = vadd.f32 %v512_v37, %v1599_v53 }
 0x5eb   :  { %v527_v39 = vsel %vm76_vm0, %v521_v38, 0.0 }
 0x5ec   :  { %528 = vadd.xlane.f32.xlu0 %v527_v39  ;;  %v1254_v39 = vld [vmem:[%s1922_s13] ss:$0 sm:$0xff] }
 0x5ee   :  { %v513_v41 = vpop.f32.mrf.mxu0 }
 0x5ef   :  { %v514_v42 = vadd.f32 %v1252_v35, %v513_v41 }
 0x5f1   :  { %v522_v43 = vadd.f32 %v514_v42, %v1601_v6 }
 0x5f3   :  { %v530_v44 = vsel %vm76_vm0, %v522_v43, 0.0 }
 0x5f4   :  { %531 = vadd.xlane.f32.xlu2 %v530_v44 }
 0x60c   :  { %v516_v45 = vpop.f32.mrf.mxu0 }
 0x60d   :  { %v517_v46 = vadd.f32 %v1252_v35, %v516_v45 }
 0x60f   :  { %v523_v47 = vadd.f32 %v517_v46, %v1610_v19 }
 0x611   :  { %v533_v48 = vsel %vm76_vm0, %v523_v47, 0.0 }
 0x612   :  { %534 = vadd.xlane.f32.xlu0 %v533_v48 }
 0x614   :  { %v518_v49 = vpop.f32.mrf.mxu0 }
 0x615   :  { %v519_v50 = vadd.f32 %v1252_v35, %v518_v49  ;;  %v1253_v35 = vld [vmem:[%s1921_s12] ss:$0 sm:$0xff] }
 0x617   :  { %v524_v53 = vadd.f32 %v519_v50, %v1612_v20 }
 0x619   :  { %v536_v51 = vsel %vm76_vm0, %v524_v53, 0.0 }
 0x61a   :  { %537 = vadd.xlane.f32.xlu2 %v536_v51 }
 0x65f   :  { %v529_v52 = vpop.xlane.xlu0 %528 }
 0x660   :  { %v539_v6 = vmul.f32 %v529_v52, %v1561_v60 }
 0x662   :  { %v543_v54 = vsub.f32 %v521_v38, %v539_v6 }
 0x664   :  { %v547_v55 = vmul.f32 %v543_v54, %v543_v54 }
 0x666   :  { %v551_v8 = vsel %vm76_vm0, %v547_v55, 0.0 }
 0x667   :  { %v532_v56 = vpop.xlane.xlu2 %531  ;;  %552 = vadd.xlane.f32.xlu0 %v551_v8 }
 0x668   :  { %v540_v19 = vmul.f32 %v532_v56, %v1561_v60 }
 0x66a   :  { %v544_v57 = vsub.f32 %v522_v43, %v540_v19 }
 0x66c   :  { %v548_v58 = vmul.f32 %v544_v57, %v544_v57 }
 0x66e   :  { %v554_v59 = vsel %vm76_vm0, %v548_v58, 0.0 }
 0x66f   :  { %555 = vadd.xlane.f32.xlu1 %v554_v59 }
 0x685   :  { %v535_v20 = vpop.xlane.xlu0 %534 }
 0x686   :  { %v541_v10 = vmul.f32 %v535_v20, %v1561_v60 }
 0x688   :  { %v1684_v61 = vsub.f32 %v523_v47, %v541_v10 }
 0x68a   :  { %v549_v62 = vmul.f32 %v1684_v61, %v1684_v61 }
 0x68c   :  { %v557_v63 = vsel %vm76_vm0, %v549_v62, 0.0 }
 0x68d   :  { %v538_v11 = vpop.xlane.xlu2 %537  ;;  %558 = vadd.xlane.f32.xlu2 %v557_v63 }
 0x68e   :  { %v542_v0 = vmul.f32 %v538_v11, %v1561_v60 }
 0x690   :  { %v1690_v1 = vsub.f32 %v524_v53, %v542_v0 }
 0x692   :  { %v550_v2 = vmul.f32 %v1690_v1, %v1690_v1 }
 0x694   :  { %v560_v3 = vsel %vm76_vm0, %v550_v2, 0.0 }
 0x695   :  { %561 = vadd.xlane.f32.xlu0 %v560_v3 }
 0x6da   :  { %v553_v12 = vpop.xlane.xlu0 %552 }
 0x6db   :  { %v563_v13 = vmul.f32 %v553_v12, %v1561_v60 }
 0x6dd   :  { %v567_v18 = vadd.f32 1e-12, %v563_v13 }
 0x6df   :  { %1298 = vrsqrt.f32 %v567_v18  ;;  %vm577_vm2 = vweird.f32 %v567_v18 }
 0x6e2   :  { %v556_v21 = vpop.xlane.xlu1 %555 }
 0x6e3   :  { %v564_v9 = vmul.f32 %v556_v21, %v1561_v60 }
 0x6e5   :  { %v1299_v22 = vpop.eup %1298  ;;  %v568_v16 = vadd.f32 1e-12, %v564_v9 }
 0x6e6   :  { %v572_v23 = vmul.f32 %v1299_v22, %v567_v18  ;;  %vm578_vm15 = vweird.f32 %v1299_v22 }
 0x6e7   :  { %1300 = vrsqrt.f32 %v568_v16  ;;  %vm579_vm3 = vmor %vm577_vm2, %vm578_vm15  ;;  %vm587_vm5 = vweird.f32 %v568_v16 }
 0x6e8   :  { %v573_v24 = vmul.f32 %v1299_v22, %v572_v23 }
 0x6ea   :  { %v574_v25 = vmul.f32 0.5, %v573_v24 }
 0x6ec   :  { %v575_v26 = vsub.f32 1.5, %v574_v25 }
 0x6ed   :  { %v1301_v27 = vpop.eup %1300 }
 0x6ee   :  { %v576_v28 = vmul.f32 %v1299_v22, %v575_v26  ;;  %v582_v29 = vmul.f32 %v1301_v27, %v568_v16  ;;  %vm588_vm4 = vweird.f32 %v1301_v27 }
 0x6ef   :  { %vm589_vm6 = vmor %vm587_vm5, %vm588_vm4 }
 0x6f0   :  { %v583_v30 = vmul.f32 %v1301_v27, %v582_v29  ;;  %v580_v32 = vsel %vm579_vm3, %v1299_v22, %v576_v28 }
 0x6f1   :  { %v611_v36 = vmul.f32 %v580_v32, %v543_v54 }
 0x6f2   :  { %v584_v33 = vmul.f32 0.5, %v583_v30 }
 0x6f3   :  { %v618_v41 = vmul.f32 %v1253_v35, %v611_v36 }
 0x6f4   :  { %v585_v34 = vsub.f32 1.5, %v584_v33 }
 0x6f5   :  { %v1715_v44 = vadd.f32 %v1254_v39, %v618_v41 }
 0x6f6   :  { %v586_v37 = vmul.f32 %v1301_v27, %v585_v34 }
 0x6f8   :  { %v590_v38 = vsel %vm589_vm6, %v1301_v27, %v586_v37 }
 0x6f9   :  { %v612_v42 = vmul.f32 %v590_v38, %v544_v57 }
 0x6fb   :  { %v619_v43 = vmul.f32 %v1253_v35, %v612_v42 }
 0x6fd   :  { %v1717_v45 = vadd.f32 %v1254_v39, %v619_v43 }
 0x6ff   :  { %v629_v46 = vpack.c.bf16 %v1717_v45, %v1715_v44 }
 0x700   :  { %v559_v47 = vpop.xlane.xlu2 %558 }
 0x701   :  { %v565_v48 = vmul.f32 %v559_v47, %v1561_v60  ;;  %1199 = vmatmul.msk.bf16.vlgmr.msra.gmra.mxu2 %vm76_vm0, %v629_v46 }
 0x703   :  { %v569_v49 = vadd.f32 1e-12, %v565_v48 }
 0x705   :  { %1302 = vrsqrt.f32 %v569_v49  ;;  %vm597_vm8 = vweird.f32 %v569_v49 }
 0x708   :  { %v562_v50 = vpop.xlane.xlu0 %561 }
 0x709   :  { %v566_v53 = vmul.f32 %v562_v50, %v1561_v60 }
 0x70b   :  { %v1303_v51 = vpop.eup %1302  ;;  %v570_v52 = vadd.f32 1e-12, %v566_v53 }
 0x70c   :  { %v592_v6 = vmul.f32 %v1303_v51, %v569_v49  ;;  %vm598_vm7 = vweird.f32 %v1303_v51 }
 0x70d   :  { %1304 = vrsqrt.f32 %v570_v52  ;;  %vm599_vm9 = vmor %vm597_vm8, %vm598_vm7  ;;  %vm607_vm11 = vweird.f32 %v570_v52 }
 0x70e   :  { %v593_v54 = vmul.f32 %v1303_v51, %v592_v6 }
 0x710   :  { %v594_v55 = vmul.f32 0.5, %v593_v54 }
 0x712   :  { %v595_v8 = vsub.f32 1.5, %v594_v55 }
 0x713   :  { %v1305_v56 = vpop.eup %1304 }
 0x714   :  { %v596_v19 = vmul.f32 %v1303_v51, %v595_v8  ;;  %v602_v57 = vmul.f32 %v1305_v56, %v570_v52  ;;  %vm608_vm10 = vweird.f32 %v1305_v56 }
 0x715   :  { %vm609_vm12 = vmor %vm607_vm11, %vm608_vm10 }
 0x716   :  { %v603_v58 = vmul.f32 %v1305_v56, %v602_v57  ;;  %v600_v59 = vsel %vm599_vm9, %v1303_v51, %v596_v19 }
 0x717   :  { %v613_v62 = vmul.f32 %v600_v59, %v1684_v61  ;;  %v1255_v61 = vld [vmem:[%s1912_s3 + $0x1] ss:$0 sm:$0xff] }
 0x718   :  { %v604_v20 = vmul.f32 0.5, %v603_v58 }
 0x719   :  { %v620_v2 = vmul.f32 %v1253_v35, %v613_v62 }
 0x71a   :  { %v605_v10 = vsub.f32 1.5, %v604_v20 }
 0x71b   :  { %v1726_v4 = vadd.f32 %v1254_v39, %v620_v2 }
 0x71c   :  { %v606_v63 = vmul.f32 %v1305_v56, %v605_v10 }
 0x71e   :  { %v610_v11 = vsel %vm609_vm12, %v1305_v56, %v606_v63 }
 0x71f   :  { %v614_v0 = vmul.f32 %v610_v11, %v1690_v1 }
 0x721   :  { %v621_v3 = vmul.f32 %v1253_v35, %v614_v0 }
 0x723   :  { %v1728_v5 = vadd.f32 %v1254_v39, %v621_v3 }
 0x725   :  { %v630_v7 = vpack.c.bf16 %v1728_v5, %v1726_v4 }
 0x727   :  { %1200 = vmatmul.msk.bf16.gmra.mxu2 %vm76_vm0, %v630_v7 }
 0x784   :  { %v658_v12 = vpop.f32.mrf.mxu2 }
 0x785   :  { %v659_v14 = vadd.f32 %v1255_v61, %v658_v12 }
 0x78c   :  { %v660_v13 = vpop.f32.mrf.mxu2 }
 0x78d   :  { %v661_v15 = vadd.f32 %v1255_v61, %v660_v13 }
 0x78f   :  { %v668_v1 = vpack.c.bf16 %v661_v15, %v659_v14 }
 0x791   :  { %670 = vrot.lane.b32.xlu1 %v668_v1, %s1368_s26 }
 0x7aa   :  { %v663_v17 = vpop.f32.mrf.mxu2 }
 0x7ab   :  { %v664_v21 = vadd.f32 %v1255_v61, %v663_v17 }
 0x7b2   :  { %v665_v18 = vpop.f32.mrf.mxu2 }
 0x7b3   :  { %v666_v9 = vadd.f32 %v1255_v61, %v665_v18 }
 0x7b5   :  { %v739_v22 = vpack.c.bf16 %v666_v9, %v664_v21  ;;  %v1207_v21 = vld [vmem:[%s1913_s4 + $0x30] sm:$0xff]  ;;  %v1208_v9 = vld [vmem:[%s1913_s4 + $0x38] sm:$0xff] }
 0x7b7   :  { %741 = vrot.lane.b32.xlu2 %v739_v22, %s1368_s26 }
 0x803   :  { %v671_v16 = vpop.permute.xlu1 %670 }
 0x804   :  { %v676_v23 = vsel %vm76_vm0, %v671_v16, 0  ;;  %v1205_v16 = vld [vmem:[%s1913_s4 + $0x20] sm:$0xff] }
 0x805   :  { %685 = vmatpush.bf16.xpose.msra.mxu1 %v676_v23  ;;  %v1206_v23 = vld [vmem:[%s1913_s4 + $0x28] sm:$0xff] }
 0x80c   :  { %1201 = vmatmul.msk.bf16.vlgmr.msra.gmra.mxu1 %vm76_vm0, %v668_v1 }
 0x811   :  { %v742_v24 = vpop.permute.xlu2 %741 }
 0x812   :  { %v747_v25 = vsel %vm76_vm0, %v742_v24, 0  ;;  %v817_v24 = vpack.c.bf16 %v1206_v23, %v1205_v16 }
 0x813   :  { %756 = vmatpush.bf16.xpose.msra.mxu0 %v747_v25 }
 0x81a   :  { %1203 = vmatmul.msk.bf16.vlgmr.msra.gmra.mxu0 %vm76_vm0, %v739_v22 }
 0x889   :  { %v687_v26 = vpop.f32.mrf.mxu1 }
 0x88a   :  { %v692_v27 = vmul.f32 0.17677669, %v687_v26 }
 0x88c   :  { %v694_v28 = vadd.f32 %v692_v27, %v1515_v31 }
 0x88e   :  { %v696_v29 = vsel %vm131_vm1, %v694_v28, -inf }
 0x88f   :  { %697 = vmax.xlane.f32.xlu0 %v696_v29 }
 0x891   :  { %v689_v30 = vpop.f32.mrf.mxu1 }
 0x892   :  { %v693_v32 = vmul.f32 0.17677669, %v689_v30 }
 0x894   :  { %v695_v33 = vadd.f32 %v693_v32, %v1515_v31  ;;  %v1256_v32 = vld [vmem:[%s1914_s5 + $0x1] ss:$0 sm:$0xff] }
 0x896   :  { %v699_v34 = vsel %vm131_vm1, %v695_v33, -inf }
 0x897   :  { %v758_v35 = vpop.f32.mrf.mxu0  ;;  %700 = vmax.xlane.f32.xlu0 %v699_v34 }
 0x898   :  { %v763_v36 = vmul.f32 0.17677669, %v758_v35 }
 0x89a   :  { %v765_v37 = vadd.f32 %v763_v36, %v1521_v40 }
 0x89c   :  { %v767_v38 = vsel %vm131_vm1, %v765_v37, -inf }
 0x89f   :  { %v760_v39 = vpop.f32.mrf.mxu0  ;;  %768 = vmax.xlane.f32.xlu0 %v767_v38 }
 0x8a0   :  { %v764_v41 = vmul.f32 0.17677669, %v760_v39 }
 0x8a2   :  { %v766_v42 = vadd.f32 %v764_v41, %v1521_v40 }
 0x8a4   :  { %v770_v43 = vsel %vm131_vm1, %v766_v42, -inf }
 0x8a5   :  { %771 = vmax.xlane.f32.xlu1 %v770_v43 }
 0x902   :  { %v698_v46 = vpop.xlane.xlu0 %697 }
 0x903   :  { %v702_v47 = vsub.f32 %v694_v28, %v698_v46 }
 0x905   :  { %v704_v31 = vmul.f32 1.442695, %v702_v47 }
 0x907   :  { %1306 = vpow2.f32 %v704_v31 }
 0x90a   :  { %v701_v48 = vpop.xlane.xlu0 %700 }
 0x90b   :  { %v703_v49 = vsub.f32 %v695_v33, %v701_v48 }
 0x90d   :  { %v1307_v50 = vpop.eup %1306  ;;  %v706_v53 = vmul.f32 1.442695, %v703_v49 }
 0x90e   :  { %v708_v51 = vsel %vm131_vm1, %v1307_v50, 0.0 }
 0x90f   :  { %1308 = vpow2.f32 %v706_v53  ;;  %709 = vadd.xlane.f32.xlu2 %v708_v51 }
 0x912   :  { %v769_v19 = vpop.xlane.xlu0 %768 }
 0x913   :  { %v773_v57 = vsub.f32 %v765_v37, %v769_v19 }
 0x915   :  { %v1309_v52 = vpop.eup %1308  ;;  %v775_v58 = vmul.f32 1.442695, %v773_v57 }
 0x916   :  { %v711_v6 = vsel %vm131_vm1, %v1309_v52, 0.0 }
 0x917   :  { %712 = vadd.xlane.f32.xlu0 %v711_v6 }
 0x918   :  { %v772_v40 = vpop.xlane.xlu1 %771 }
 0x919   :  { %v774_v54 = vsub.f32 %v766_v42, %v772_v40 }
 0x91b   :  { %v777_v55 = vmul.f32 1.442695, %v774_v54 }
 0x91d   :  { %1310 = vpow2.f32 %v777_v55 }
 0x91e   :  { %1312 = vpow2.f32 %v775_v58 }
 0x923   :  { %v1311_v8 = vpop.eup %1310 }
 0x924   :  { %v782_v56 = vsel %vm131_vm1, %v1311_v8, 0.0  ;;  %v1313_v59 = vpop.eup %1312 }
 0x925   :  { %783 = vadd.xlane.f32.xlu1 %v782_v56  ;;  %v779_v20 = vsel %vm131_vm1, %v1313_v59, 0.0 }
 0x927   :  { %790 = vrot.lane.b32.xlu2 %v739_v22, %s1369_s1  ;;  %v818_v22 = vpack.c.bf16 %v1208_v9, %v1207_v21 }
 0x929   :  { %836 = vmatpush.bf16.msrb.mxu1 %v818_v22 }
 0x92b   :  { %719 = vrot.lane.b32.xlu0 %v668_v1, %s1369_s1 }
 0x92d   :  { %837 = vmatpush.bf16.msrb.mxu1 %v817_v24 }
 0x955   :  { %780 = vadd.xlane.f32.xlu0 %v779_v20 }
 0x982   :  { %v710_v10 = vpop.xlane.xlu2 %709 }
 0x98a   :  { %v791_v62 = vpop.permute.xlu2 %790  ;;  %v713_v63 = vpop.xlane.xlu0 %712 }
 0x98b   :  { %803 = vmatpush.bf16.msrb.mxu0 %v791_v62  ;;  %1314 = vrcp.f32 %v713_v63  ;;  %v1216_v63 = vld [vmem:[%s1917_s8 + $0x30] sm:$0xff] }
 0x98c   :  { %1316 = vrcp.f32 %v710_v10 }
 0x991   :  { %v1315_v11 = vpop.eup %1314 }
 0x992   :  { %v1317_v0 = vpop.eup %1316  ;;  %v717_v2 = vmul.f32 %v1315_v11, %v1309_v52  ;;  %v1217_v11 = vld [vmem:[%s1917_s8 + $0x38] sm:$0xff] }
 0x993   :  { %v716_v3 = vmul.f32 %v1317_v0, %v1307_v50  ;;  %v967_v0 = vpack.c.bf16 %v1217_v11, %v1216_v63  ;;  %v1235_v11 = vld [vmem:[%s1919_s10 + $0xf0] sm:$0xff] }
 0x995   :  { %v718_v12 = vpack.c.bf16 %v717_v2, %v716_v3 }
 0x998   :  { %v784_v61 = vpop.xlane.xlu1 %783 }
 0x999   :  { %1318 = vrcp.f32 %v784_v61 }
 0x99d   :  { %v720_v7 = vpop.permute.xlu0 %719 }
 0x99e   :  { %732 = vmatpush.bf16.msra.mxu3 %v720_v7  ;;  %v1214_v7 = vld [vmem:[%s1917_s8 + $0x20] sm:$0xff] }
 0x99f   :  { %v1319_v14 = vpop.eup %1318 }
 0x9a0   :  { %v788_v1 = vmul.f32 %v1319_v14, %v1311_v8 }
 0x9a1   :  { %1202 = vmatmul.msk.bf16.vlgmr.msra.gmra.mxu3 %vm131_vm1, %v718_v12  ;;  %v1215_v12 = vld [vmem:[%s1917_s8 + $0x28] sm:$0xff] }
 0x9a2   :  { %985 = vmatpush.bf16.msrb.mxu3 %v967_v0  ;;  %v966_v61 = vpack.c.bf16 %v1215_v12, %v1214_v7  ;;  %v1231_v7 = vld [vmem:[%s1919_s10 + $0xd0] sm:$0xff]  ;;  %v1232_v12 = vld [vmem:[%s1919_s10 + $0xd8] sm:$0xff] }
 0x9a6   :  { %986 = vmatpush.bf16.msrb.mxu3 %v966_v61  ;;  %v1058_v61 = vpack.c.bf16 %v1232_v12, %v1231_v7 }
 0x9c8   :  { %v781_v13 = vpop.xlane.xlu0 %780 }
 0x9c9   :  { %1320 = vrcp.f32 %v781_v13 }
 0x9cf   :  { %v1321_v15 = vpop.eup %1320 }
 0x9d0   :  { %v787_v17 = vmul.f32 %v1321_v15, %v1313_v59 }
 0x9d2   :  { %v789_v18 = vpack.c.bf16 %v788_v1, %v787_v17 }
 0x9d4   :  { %1204 = vmatmul.msk.bf16.vlgmr.msrb.gmra.mxu0 %vm131_vm1, %v789_v18 }
 0xa24   :  { %v734_v25 = vpop.f32.mrf.mxu3 }
 0xa2c   :  { %v736_v26 = vpop.f32.mrf.mxu3 }
 0xa2d   :  { %v810_v27 = vpack.c.bf16 %v736_v26, %v734_v25 }
 0xa2f   :  { %1210 = vmatmul.msk.bf16.vlgmr.msrb.gmra.mxu1 %vm76_vm0, %v810_v27 }
 0xa51   :  { %v805_v28 = vpop.f32.mrf.mxu0 }
 0xa59   :  { %v807_v29 = vpop.f32.mrf.mxu0 }
 0xa5a   :  { %v811_v30 = vpack.c.bf16 %v807_v29, %v805_v28  ;;  %v1257_v29 = vld [vmem:[%s1915_s6 + $0x1] ss:$0 sm:$0xff] }
 0xa5c   :  { %1211 = vmatmul.msk.bf16.gmra.mxu1 %vm76_vm0, %v811_v30 }
 0xaac   :  { %v839_v33 = vpop.f32.mrf.mxu1 }
 0xaad   :  { %v840_v34 = vadd.f32 %v1256_v32, %v839_v33 }
 0xaaf   :  { %v849_v35 = vadd.f32 %v840_v34, %v1715_v44  ;;  %v1258_v34 = vld [vmem:[%s1916_s7 + $0x1] ss:$0 sm:$0xff] }
 0xab1   :  { %v857_v36 = vsel %vm76_vm0, %v849_v35, 0.0 }
 0xab2   :  { %858 = vadd.xlane.f32.xlu1 %v857_v36 }
 0xab4   :  { %v841_v37 = vpop.f32.mrf.mxu1 }
 0xab5   :  { %v842_v38 = vadd.f32 %v1256_v32, %v841_v37 }
 0xab7   :  { %v850_v39 = vadd.f32 %v842_v38, %v1717_v45 }
 0xab9   :  { %v860_v41 = vsel %vm76_vm0, %v850_v39, 0.0 }
 0xaba   :  { %861 = vadd.xlane.f32.xlu1 %v860_v41 }
 0xad9   :  { %v844_v42 = vpop.f32.mrf.mxu1 }
 0xada   :  { %v845_v43 = vadd.f32 %v1256_v32, %v844_v42 }
 0xadc   :  { %v851_v46 = vadd.f32 %v845_v43, %v1726_v4 }
 0xade   :  { %v863_v47 = vsel %vm76_vm0, %v851_v46, 0.0 }
 0xadf   :  { %864 = vadd.xlane.f32.xlu1 %v863_v47 }
 0xae1   :  { %v846_v31 = vpop.f32.mrf.mxu1 }
 0xae2   :  { %v847_v48 = vadd.f32 %v1256_v32, %v846_v31 }
 0xae4   :  { %v852_v44 = vadd.f32 %v847_v48, %v1728_v5 }
 0xae6   :  { %v866_v49 = vsel %vm76_vm0, %v852_v44, 0.0 }
 0xae7   :  { %867 = vadd.xlane.f32.xlu2 %v866_v49 }
 0xb25   :  { %v859_v50 = vpop.xlane.xlu1 %858 }
 0xb26   :  { %v869_v45 = vmul.f32 %v859_v50, %v1561_v60 }
 0xb28   :  { %v873_v53 = vsub.f32 %v849_v35, %v869_v45 }
 0xb2a   :  { %v877_v51 = vmul.f32 %v873_v53, %v873_v53 }
 0xb2c   :  { %v881_v52 = vsel %vm76_vm0, %v877_v51, 0.0 }
 0xb2d   :  { %882 = vadd.xlane.f32.xlu1 %v881_v52  ;;  %v862_v6 = vpop.xlane.xlu1 %861 }
 0xb2e   :  { %v870_v4 = vmul.f32 %v862_v6, %v1561_v60 }
 0xb30   :  { %v874_v40 = vsub.f32 %v850_v39, %v870_v4 }
 0xb32   :  { %v878_v54 = vmul.f32 %v874_v40, %v874_v40 }
 0xb34   :  { %v884_v55 = vsel %vm76_vm0, %v878_v54, 0.0 }
 0xb35   :  { %885 = vadd.xlane.f32.xlu0 %v884_v55 }
 0xb52   :  { %v865_v5 = vpop.xlane.xlu1 %864 }
 0xb53   :  { %v871_v8 = vmul.f32 %v865_v5, %v1561_v60 }
 0xb55   :  { %v1788_v56 = vsub.f32 %v851_v46, %v871_v8 }
 0xb57   :  { %v879_v19 = vmul.f32 %v1788_v56, %v1788_v56 }
 0xb59   :  { %v887_v57 = vsel %vm76_vm0, %v879_v19, 0.0 }
 0xb5a   :  { %v868_v58 = vpop.xlane.xlu2 %867  ;;  %888 = vadd.xlane.f32.xlu1 %v887_v57 }
 0xb5b   :  { %v872_v59 = vmul.f32 %v868_v58, %v1561_v60 }
 0xb5d   :  { %v1794_v20 = vsub.f32 %v852_v44, %v872_v59 }
 0xb5f   :  { %v880_v10 = vmul.f32 %v1794_v20, %v1794_v20 }
 0xb61   :  { %v890_v62 = vsel %vm76_vm0, %v880_v10, 0.0 }
 0xb62   :  { %891 = vadd.xlane.f32.xlu0 %v890_v62 }
 0xba0   :  { %v883_v2 = vpop.xlane.xlu1 %882 }
 0xba1   :  { %v893_v3 = vmul.f32 %v883_v2, %v1561_v60  ;;  %v1234_v2 = vld [vmem:[%s1919_s10 + $0xe8] sm:$0xff] }
 0xba3   :  { %v897_v13 = vadd.f32 1e-12, %v893_v3 }
 0xba5   :  { %1322 = vrsqrt.f32 %v897_v13  ;;  %vm907_vm13 = vweird.f32 %v897_v13 }
 0xba8   :  { %v886_v14 = vpop.xlane.xlu0 %885 }
 0xba9   :  { %v894_v15 = vmul.f32 %v886_v14, %v1561_v60  ;;  %v1230_v14 = vld [vmem:[%s1919_s10 + $0xc8] sm:$0xff] }
 0xbab   :  { %v1323_v1 = vpop.eup %1322  ;;  %v898_v17 = vadd.f32 1e-12, %v894_v15 }
 0xbac   :  { %v902_v18 = vmul.f32 %v1323_v1, %v897_v13  ;;  %vm908_vm1 = vweird.f32 %v1323_v1  ;;  %v1229_v13 = vld [vmem:[%s1919_s10 + $0xc0] sm:$0xff] }
 0xbad   :  { %1324 = vrsqrt.f32 %v898_v17  ;;  %vm909_vm14 = vmor %vm907_vm13, %vm908_vm1  ;;  %vm917_vm2 = vweird.f32 %v898_v17  ;;  %v1057_v15 = vpack.c.bf16 %v1230_v14, %v1229_v13 }
 0xbae   :  { %v903_v21 = vmul.f32 %v1323_v1, %v902_v18 }
 0xbb0   :  { %v904_v9 = vmul.f32 0.5, %v903_v21  ;;  %v1225_v21 = vld [vmem:[%s1919_s10 + $0xa0] sm:$0xff] }
 0xbb2   :  { %v905_v22 = vsub.f32 1.5, %v904_v9  ;;  %v1226_v9 = vld [vmem:[%s1919_s10 + $0xa8] sm:$0xff] }
 0xbb3   :  { %v1325_v16 = vpop.eup %1324 }
 0xbb4   :  { %v906_v23 = vmul.f32 %v1323_v1, %v905_v22  ;;  %v912_v24 = vmul.f32 %v1325_v16, %v898_v17  ;;  %vm918_vm15 = vweird.f32 %v1325_v16  ;;  %v1228_v17 = vld [vmem:[%s1919_s10 + $0xb8] sm:$0xff]  ;;  %v1055_v22 = vpack.c.bf16 %v1226_v9, %v1225_v21 }
 0xbb5   :  { %vm919_vm3 = vmor %vm917_vm2, %vm918_vm15  ;;  %vm1156_vm15 = vcmask 7168   ;;  %vm1166_vm2 = vcmask 15367  }
 0xbb6   :  { %v913_v25 = vmul.f32 %v1325_v16, %v912_v24  ;;  %v910_v26 = vsel %vm909_vm14, %v1323_v1, %v906_v23  ;;  %v1227_v1 = vld [vmem:[%s1919_s10 + $0xb0] sm:$0xff]  ;;  %v1224_v23 = vld [vmem:[%s1919_s10 + $0x98] sm:$0xff] }
 0xbb7   :  { %v941_v30 = vmul.f32 %v910_v26, %v873_v53  ;;  %v1056_v18 = vpack.c.bf16 %v1228_v17, %v1227_v1  ;;  %v1221_v26 = vld [vmem:[%s1919_s10 + $0x80] sm:$0xff] }
 0xbb8   :  { %v914_v27 = vmul.f32 0.5, %v913_v25  ;;  %v1259_v25 = vld [vmem:[%s1918_s9 + $0x1] ss:$0 sm:$0xff] }
 0xbb9   :  { %v948_v35 = vmul.f32 %v1257_v29, %v941_v30 }
 0xbba   :  { %v915_v28 = vsub.f32 1.5, %v914_v27  ;;  %v1222_v27 = vld [vmem:[%s1919_s10 + $0x88] sm:$0xff] }
 0xbbb   :  { %v955_v38 = vadd.f32 %v1258_v34, %v948_v35 }
 0xbbc   :  { %v916_v32 = vmul.f32 %v1325_v16, %v915_v28  ;;  %v1053_v28 = vpack.c.bf16 %v1222_v27, %v1221_v26 }
 0xbbe   :  { %v920_v33 = vsel %vm919_vm3, %v1325_v16, %v916_v32  ;;  %v1223_v16 = vld [vmem:[%s1919_s10 + $0x90] sm:$0xff] }
 0xbbf   :  { %v942_v36 = vmul.f32 %v920_v33, %v874_v40  ;;  %v1054_v24 = vpack.c.bf16 %v1224_v23, %v1223_v16 }
 0xbc1   :  { %v949_v37 = vmul.f32 %v1257_v29, %v942_v36 }
 0xbc3   :  { %v1819_v39 = vadd.f32 %v1258_v34, %v949_v37 }
 0xbc5   :  { %v959_v41 = vpack.c.bf16 %v1819_v39, %v955_v38 }
 0xbc7   :  { %1219 = vmatmul.msk.bf16.vlgmr.msrb.gmra.mxu3 %vm76_vm0, %v959_v41 }
 0xbcd   :  { %v889_v42 = vpop.xlane.xlu1 %888 }
 0xbce   :  { %v895_v43 = vmul.f32 %v889_v42, %v1561_v60 }
 0xbd0   :  { %v899_v46 = vadd.f32 1e-12, %v895_v43 }
 0xbd2   :  { %1326 = vrsqrt.f32 %v899_v46  ;;  %vm927_vm5 = vweird.f32 %v899_v46 }
 0xbd5   :  { %v892_v47 = vpop.xlane.xlu0 %891 }
 0xbd6   :  { %v896_v31 = vmul.f32 %v892_v47, %v1561_v60 }
 0xbd8   :  { %v1327_v48 = vpop.eup %1326  ;;  %v900_v44 = vadd.f32 1e-12, %v896_v31 }
 0xbd9   :  { %v922_v49 = vmul.f32 %v1327_v48, %v899_v46  ;;  %vm928_vm4 = vweird.f32 %v1327_v48 }
 0xbda   :  { %1328 = vrsqrt.f32 %v900_v44  ;;  %vm929_vm6 = vmor %vm927_vm5, %vm928_vm4  ;;  %vm937_vm8 = vweird.f32 %v900_v44 }
 0xbdb   :  { %v923_v50 = vmul.f32 %v1327_v48, %v922_v49 }
 0xbdd   :  { %v924_v45 = vmul.f32 0.5, %v923_v50 }
 0xbdf   :  { %v925_v53 = vsub.f32 1.5, %v924_v45 }
 0xbe0   :  { %v1329_v51 = vpop.eup %1328 }
 0xbe1   :  { %v926_v52 = vmul.f32 %v1327_v48, %v925_v53  ;;  %v932_v6 = vmul.f32 %v1329_v51, %v900_v44  ;;  %vm938_vm7 = vweird.f32 %v1329_v51 }
 0xbe2   :  { %vm939_vm9 = vmor %vm937_vm8, %vm938_vm7 }
 0xbe3   :  { %v933_v4 = vmul.f32 %v1329_v51, %v932_v6  ;;  %v930_v40 = vsel %vm929_vm6, %v1327_v48, %v926_v52 }
 0xbe4   :  { %v943_v5 = vmul.f32 %v930_v40, %v1788_v56  ;;  %v1236_v56 = vld [vmem:[%s1919_s10 + $0xf8] sm:$0xff] }
 0xbe5   :  { %v934_v54 = vmul.f32 0.5, %v933_v4  ;;  %v1060_v0 = vpack.c.bf16 %v1236_v56, %v1235_v11 }
 0xbe6   :  { %v950_v58 = vmul.f32 %v1257_v29, %v943_v5 }
 0xbe7   :  { %v935_v55 = vsub.f32 1.5, %v934_v54  ;;  %1066 = vmatpush.bf16.msrb.mxu2 %v1060_v0 }
 0xbe8   :  { %v957_v10 = vadd.f32 %v1258_v34, %v950_v58 }
 0xbe9   :  { %v936_v8 = vmul.f32 %v1329_v51, %v935_v55 }
 0xbeb   :  { %v940_v19 = vsel %vm939_vm9, %v1329_v51, %v936_v8 }
 0xbec   :  { %v944_v57 = vmul.f32 %v940_v19, %v1794_v20  ;;  %v1233_v20 = vld [vmem:[%s1919_s10 + $0xe0] sm:$0xff] }
 0xbed   :  { %v1059_v3 = vpack.c.bf16 %v1234_v2, %v1233_v20 }
 0xbee   :  { %v951_v59 = vmul.f32 %v1257_v29, %v944_v57 }
 0xbef   :  { %1067 = vmatpush.bf16.msrb.mxu2 %v1059_v3 }
 0xbf0   :  { %v1827_v62 = vadd.f32 %v1258_v34, %v951_v59 }
 0xbf2   :  { %v960_v63 = vpack.c.bf16 %v1827_v62, %v957_v10 }
 0xbf3   :  { %1068 = vmatpush.bf16.msrb.mxu2 %v1058_v61 }
 0xbf4   :  { %1220 = vmatmul.msk.bf16.gmra.mxu3 %vm76_vm0, %v960_v63 }
 0xbf7   :  { %1069 = vmatpush.bf16.msrb.mxu2 %v1057_v15  ;;  %v1260_v15 = vld [vmem:[%s1920_s11 + $0x1] ss:$0 sm:$0xff] }
 0xbfb   :  { %1070 = vmatpush.bf16.msrb.mxu2 %v1056_v18 }
 0xbff   :  { %1071 = vmatpush.bf16.msrb.mxu2 %v1055_v22 }
 0xc03   :  { %1072 = vmatpush.bf16.msrb.mxu2 %v1054_v24 }
 0xc07   :  { %1073 = vmatpush.bf16.msrb.mxu2 %v1053_v28 }
 0xc4a   :  { %v988_v29 = vpop.f32.mrf.mxu3 }
 0xc4b   :  { %v989_v30 = vadd.f32 %v1259_v25, %v988_v29 }
 0xc4d   :  { %v998_v32 = vmul.f32 %v989_v30, %v989_v30 }
 0xc4f   :  { %v1002_v33 = vmul.f32 %v998_v32, %v989_v30 }
 0xc51   :  { %v1006_v34 = vmul.f32 0.044715, %v1002_v33 }
 0xc52   :  { %v990_v35 = vpop.f32.mrf.mxu3 }
 0xc53   :  { %v1010_v36 = vadd.f32 %v1006_v34, %v989_v30  ;;  %v991_v37 = vadd.f32 %v1259_v25, %v990_v35 }
 0xc55   :  { %v1014_v38 = vmul.f32 0.7978846, %v1010_v36  ;;  %v999_v41 = vmul.f32 %v991_v37, %v991_v37 }
 0xc57   :  { %v1003_v42 = vmul.f32 %v999_v41, %v991_v37  ;;  %1330 = vtanh.f32 %v1014_v38 }
 0xc59   :  { %v1007_v43 = vmul.f32 0.044715, %v1003_v42 }
 0xc5b   :  { %v1011_v46 = vadd.f32 %v1007_v43, %v991_v37 }
 0xc5d   :  { %v1015_v47 = vmul.f32 0.7978846, %v1011_v46  ;;  %v1331_v31 = vpop.eup %1330 }
 0xc5e   :  { %v1022_v48 = vadd.f32 1.0, %v1331_v31 }
 0xc5f   :  { %1332 = vtanh.f32 %v1015_v47  ;;  %v1261_v47 = vld [vmem:[%s1921_s12 + $0x1] ss:$0 sm:$0xff]  ;;  %s1372_s12 = smov [#allocation3]  }
 0xc60   :  { %v1026_v49 = vmul.f32 0.5, %v1022_v48 }
 0xc62   :  { %v1030_v53 = vmul.f32 %v1026_v49, %v989_v30 }
 0xc65   :  { %v1333_v44 = vpop.eup %1332 }
 0xc66   :  { %v1023_v50 = vadd.f32 1.0, %v1333_v44  ;;  %v1262_v44 = vld [vmem:[%s1922_s13 + $0x1] ss:$0 sm:$0xff]  ;;  %s1173_s13 = sshll.u32 %s1372_s12, 4  ;;  %s1174_s13 = int_to_ptr.vmem [resolvable:$true] %s1173_s13 }
 0xc68   :  { %v1027_v45 = vmul.f32 0.5, %v1023_v50  ;;  %v1263_v50 = vld [vmem:[%s1923_s14] ss:$0 sm:$0xff] }
 0xc6a   :  { %v1031_v51 = vmul.f32 %v1027_v45, %v991_v37 }
 0xc6c   :  { %v1034_v52 = vpack.c.bf16 %v1031_v51, %v1030_v53 }
 0xc6e   :  { %1074 = vmatmul.bf16.vlgmr.msrb.gmra.mxu2 %v1034_v52 }
 0xc77   :  { %v993_v6 = vpop.f32.mrf.mxu3 }
 0xc78   :  { %v994_v4 = vadd.f32 %v1259_v25, %v993_v6  ;;  %v1158_v6 = vld [vmem:[#allocation2] sm:$0x1] }
 0xc7a   :  { %v1000_v40 = vmul.f32 %v994_v4, %v994_v4 }
 0xc7c   :  { %v1004_v54 = vmul.f32 %v1000_v40, %v994_v4  ;;  %v1371_v40 = vmov 0  }
 0xc7d   :  { %1245 = vset.pattern.permute.xlu2 %v1371_v40  ;;  %1246 = vset.pattern.permute.xlu0 %v1371_v40 }
 0xc7e   :  { %v1008_v55 = vmul.f32 0.044715, %v1004_v54  ;;  %1161 = vperm.xlu2 %1245, %v1158_v6  }
 0xc7f   :  { %v995_v5 = vpop.f32.mrf.mxu3 }
 0xc80   :  { %v1012_v8 = vadd.f32 %v1008_v55, %v994_v4  ;;  %v996_v19 = vadd.f32 %v1259_v25, %v995_v5 }
 0xc82   :  { %v1001_v57 = vmul.f32 %v996_v19, %v996_v19  ;;  %v1016_v58 = vmul.f32 0.7978846, %v1012_v8 }
 0xc84   :  { %v1005_v59 = vmul.f32 %v1001_v57, %v996_v19  ;;  %1334 = vtanh.f32 %v1016_v58 }
 0xc86   :  { %v1009_v10 = vmul.f32 0.044715, %v1005_v59 }
 0xc88   :  { %v1013_v63 = vadd.f32 %v1009_v10, %v996_v19 }
 0xc8a   :  { %v1017_v11 = vmul.f32 0.7978846, %v1013_v63  ;;  %v1335_v56 = vpop.eup %1334 }
 0xc8b   :  { %v1024_v0 = vadd.f32 1.0, %v1335_v56 }
 0xc8c   :  { %1336 = vtanh.f32 %v1017_v11 }
 0xc8d   :  { %v1028_v3 = vmul.f32 0.5, %v1024_v0 }
 0xc8f   :  { %v1032_v12 = vmul.f32 %v1028_v3, %v994_v4 }
 0xc92   :  { %v1337_v20 = vpop.eup %1336 }
 0xc93   :  { %v1025_v2 = vadd.f32 1.0, %v1337_v20 }
 0xc95   :  { %v1029_v7 = vmul.f32 0.5, %v1025_v2 }
 0xc97   :  { %v1033_v61 = vmul.f32 %v1029_v7, %v996_v19 }
 0xc99   :  { %v1035_v13 = vpack.c.bf16 %v1033_v61, %v1032_v12 }
 0xc9b   :  { %1078 = vmatmul.bf16.gmra.mxu2 %v1035_v13 }
 0xcd8   :  { %v1162_v0 = vpop.permute.xlu2 %1161 }
 0xcd9   :  { %v1164_v20 = vperm.slane %v1162_v0, 0 }
 0xcf1   :  { %v1075_v14 = vpop.f32.mrf.mxu2 }
 0xcf9   :  { %v1076_v1 = vpop.f32.mrf.mxu2 }
 0xcfa   :  { %v1077_v17 = vadd.f32 %v1260_v15, %v1076_v1 }
 0xcfc   :  { %v1083_v18 = vadd.f32 %v1077_v17, %v1819_v39 }
 0xcfe   :  { %v1089_v21 = vsel %vm76_vm0, %v1083_v18, 0.0 }
 0xcff   :  { %1090 = vadd.xlane.f32.xlu1 %v1089_v21 }
 0xd1e   :  { %v1079_v9 = vpop.f32.mrf.mxu2 }
 0xd26   :  { %v1080_v22 = vpop.f32.mrf.mxu2 }
 0xd27   :  { %v1081_v16 = vadd.f32 %v1260_v15, %v1080_v22 }
 0xd29   :  { %v1084_v23 = vadd.f32 %v1081_v16, %v1827_v62 }
 0xd2b   :  { %v1092_v24 = vsel %vm76_vm0, %v1084_v23, 0.0 }
 0xd2c   :  { %1093 = vadd.xlane.f32.xlu0 %v1092_v24 }
 0xd72   :  { %v1091_v25 = vpop.xlane.xlu1 %1090 }
 0xd73   :  { %v1095_v26 = vmul.f32 %v1091_v25, %v1561_v60 }
 0xd75   :  { %v1097_v27 = vsub.f32 %v1083_v18, %v1095_v26 }
 0xd77   :  { %v1099_v28 = vmul.f32 %v1097_v27, %v1097_v27 }
 0xd79   :  { %v1101_v29 = vsel %vm76_vm0, %v1099_v28, 0.0 }
 0xd7a   :  { %1102 = vadd.xlane.f32.xlu1 %v1101_v29 }
 0xd9f   :  { %v1094_v39 = vpop.xlane.xlu0 %1093 }
 0xda0   :  { %v1096_v30 = vmul.f32 %v1094_v39, %v1561_v60 }
 0xda2   :  { %v1098_v32 = vsub.f32 %v1084_v23, %v1096_v30 }
 0xda4   :  { %v1100_v33 = vmul.f32 %v1098_v32, %v1098_v32 }
 0xda6   :  { %v1104_v34 = vsel %vm76_vm0, %v1100_v33, 0.0  ;;  %vm1148_vm0 = vcmask 261127  }
 0xda7   :  { %1105 = vadd.xlane.f32.xlu0 %v1104_v34 }
 0xded   :  { %v1103_v62 = vpop.xlane.xlu1 %1102 }
 0xdee   :  { %v1107_v35 = vmul.f32 %v1103_v62, %v1561_v60 }
 0xdf0   :  { %v1109_v36 = vadd.f32 1e-12, %v1107_v35 }
 0xdf2   :  { %1338 = vrsqrt.f32 %v1109_v36  ;;  %vm1117_vm11 = vweird.f32 %v1109_v36 }
 0xdf8   :  { %v1339_v37 = vpop.eup %1338 }
 0xdf9   :  { %v1112_v38 = vmul.f32 %v1339_v37, %v1109_v36  ;;  %vm1118_vm10 = vweird.f32 %v1339_v37 }
 0xdfa   :  { %vm1119_vm12 = vmor %vm1117_vm11, %vm1118_vm10 }
 0xdfb   :  { %v1113_v41 = vmul.f32 %v1339_v37, %v1112_v38 }
 0xdfd   :  { %v1114_v42 = vmul.f32 0.5, %v1113_v41 }
 0xdff   :  { %v1115_v43 = vsub.f32 1.5, %v1114_v42 }
 0xe01   :  { %v1116_v46 = vmul.f32 %v1339_v37, %v1115_v43 }
 0xe03   :  { %v1120_v31 = vsel %vm1119_vm12, %v1339_v37, %v1116_v46 }
 0xe04   :  { %v1131_v48 = vmul.f32 %v1120_v31, %v1097_v27 }
 0xe06   :  { %v1136_v49 = vmul.f32 %v1261_v47, %v1131_v48 }
 0xe08   :  { %v1141_v45 = vadd.f32 %v1262_v44, %v1136_v49 }
 0xe0a   :  { %v1147_v53 = vmul.f32 %v1263_v50, %v1141_v45 }
 0xe0c   :  { %v1149_v51 = vsel %vm1148_vm0, %v1147_v53, 0.0 }
 0xe0d   :  { %1150 = vadd.xlane.f32.xlu1 %v1149_v51 }
 0xe1a   :  { %v1106_v52 = vpop.xlane.xlu0 %1105 }
 0xe1b   :  { %v1108_v4 = vmul.f32 %v1106_v52, %v1561_v60 }
 0xe1d   :  { %v1110_v54 = vadd.f32 1e-12, %v1108_v4 }
 0xe1f   :  { %1340 = vrsqrt.f32 %v1110_v54  ;;  %vm1127_vm13 = vweird.f32 %v1110_v54 }
 0xe25   :  { %v1341_v55 = vpop.eup %1340 }
 0xe26   :  { %v1122_v5 = vmul.f32 %v1341_v55, %v1110_v54  ;;  %vm1128_vm1 = vweird.f32 %v1341_v55 }
 0xe27   :  { %vm1129_vm14 = vmor %vm1127_vm13, %vm1128_vm1 }
 0xe28   :  { %v1123_v8 = vmul.f32 %v1341_v55, %v1122_v5 }
 0xe2a   :  { %v1124_v19 = vmul.f32 0.5, %v1123_v8 }
 0xe2c   :  { %v1125_v57 = vsub.f32 1.5, %v1124_v19 }
 0xe2e   :  { %v1126_v58 = vmul.f32 %v1341_v55, %v1125_v57 }
 0xe30   :  { %v1130_v59 = vsel %vm1129_vm14, %v1341_v55, %v1126_v58 }
 0xe31   :  { %v1132_v10 = vmul.f32 %v1130_v59, %v1098_v32 }
 0xe33   :  { %v1137_v63 = vmul.f32 %v1261_v47, %v1132_v10 }
 0xe35   :  { %v1142_v11 = vadd.f32 %v1262_v44, %v1137_v63 }
 0xe37   :  { %v1152_v60 = vmul.f32 %v1263_v50, %v1142_v11 }
 0xe39   :  { %v1153_v56 = vsel %vm1148_vm0, %v1152_v60, 0.0 }
 0xe3a   :  { %1154 = vadd.xlane.f32.xlu0 %v1153_v56 }
 0xe80   :  { %v1151_v2 = vpop.xlane.xlu1 %1150 }
 0xead   :  { %v1155_v3 = vpop.xlane.xlu0 %1154 }
 0xeae   :  { %v1157_v7 = vsel %vm1156_vm15, %v1151_v2, %v1155_v3 }
 0xeaf   :  { %v1165_v12 = vadd.f32 %v1164_v20, %v1157_v7 }
 0xeb1   :  { %1167 = vst.msk [vmem:[#allocation3 - $0x7] sm:$0x80] %vm1166_vm2, %v1165_v12 }
 0xeb2   :  { %1178 = dma.vmem_to_hbm [thread:$0]  %s1174_s13, 16, %s1176_s18, [#allocation4]  }
 0xeb3   :  { %1366 = dma.done.wait [#allocation4], 16  }
 0xeb4   :  { %1367 = vsyncadd [#allocation4], 4294967280 }
 0xeb5   :  { %1183 = vsyncpa [#allocation4], 1 }

</bundles_post_ra>
